<compile_context>
chip_gen: v6e
topology: v6e:2x2x1
jax: 0.10.0
libtpu: 0.0.40
codegen_flags: <defaults>
</compile_context>

<pallas_src>
import functools

import jax
import jax.numpy as jnp
from jax.experimental import pallas as pl
from jax.experimental.pallas import tpu as pltpu

EPS = 1e-5

# MXU input dtype for the conv matmuls.  f32 keeps exact parity with the XLA f32
# reference at this toy size; for real channel counts switch to jnp.bfloat16
# (accumulation stays f32 via preferred_element_type).  BN / ReLU math stays f32
# either way (v5e has no bf16 VPU/EUP path).
MXU_DTYPE = jnp.float32


def _vgg_block_kernel(xh_ref, band1_ref, band2_ref, gsum_ref, p1_ref, p2_ref,
                      wsel_ref, hsel_ref, o_ref, y1p_ref, *, n_spatial):
    # xh_ref:    (N, H+2, W*Cin)   H-padded input, (W, C) flattened onto lanes
    # band*_ref: (3, K, W*Cout)    banded conv weights (K = W*Cin / W*Cout)
    # gsum_ref:  (W*Cout, W*Cout)  per-channel group-sum / broadcast matrix
    # p*_ref:    (3, W*Cout)       rows = conv bias / gamma / beta, tiled across W
    # wsel_ref:  (2, W*Cout, Wh*Cout)  even/odd W-pool selection
    # hsel_ref:  (2, N*Hh, N*H)        even/odd H-pool selection
    # o_ref:     (N*Hh, Wh*Cout)
    # y1p_ref:   (N, H+2, W*Cout)  VMEM scratch for the H-padded conv1 output
    N, Hp, _ = xh_ref.shape
    H = Hp - 2
    M = N * H
    WC = band1_ref.shape[-1]
    inv_n = 1.0 / n_spatial
    f32 = jnp.float32

    def conv3x3(src_ref, band_ref):
        # 3 lane-dense MXU matmuls; dx taps + all W positions are folded into K / N.
        # acc is (M, WC) = 4 vregs, so register accumulation over 3 taps is cheap.
        acc = jnp.zeros((M, WC), f32)
        for dy in range(3):
            slab = src_ref[:, dy:dy + H, :]          # contiguous dy row slab
            acc = acc + jnp.dot(
                slab.reshape(M, slab.shape[-1]).astype(MXU_DTYPE),
                band_ref[dy].astype(MXU_DTYPE),
                preferred_element_type=f32)
        return acc

    def bias_bn_relu(acc, p_ref):
        # PyTorch training-mode BatchNorm2d: biased batch stats over (N, H, W).
        x = acc + p_ref[0:1, :]                      # conv bias (kept for exactness)
        # Per-channel reduce (and broadcast back to all W lane-groups) as a tiny
        # ones-block matmul on the otherwise-idle MXU -> no lane<->sublane shuffles.
        mean = jnp.dot(jnp.sum(x, axis=0, keepdims=True), gsum_ref[...],
                       preferred_element_type=f32) * inv_n
        d = x - mean
        var = jnp.dot(jnp.sum(d * d, axis=0, keepdims=True), gsum_ref[...],
                      preferred_element_type=f32) * inv_n
        scale = p_ref[1:2, :] * jax.lax.rsqrt(var + EPS)      # gamma / sqrt(var+eps)
        return jnp.maximum(d * scale + p_ref[2:3, :], 0.0)    # + beta, ReLU

    # ---- conv1 -> BN1 -> ReLU ------------------------------------------------
    y1 = bias_bn_relu(conv3x3(xh_ref, band1_ref), p1_ref)

    # ---- stage H-padded intermediate: ONE store, zero border rows folded in ---
    zrow = jnp.zeros((N, 1, WC), f32)
    y1p_ref[...] = jnp.concatenate([zrow, y1.reshape(N, H, WC), zrow], axis=1)

    # ---- conv2 (full width) -> BN2 -> ReLU -------------------------------------
    y2 = bias_bn_relu(conv3x3(y1p_ref, band2_ref), p2_ref)

    # ---- MaxPool2d(2) fully on register values: even/odd selection matmuls -----
    pw = jnp.maximum(jnp.dot(y2, wsel_ref[0], preferred_element_type=f32),
                     jnp.dot(y2, wsel_ref[1], preferred_element_type=f32))
    o_ref[...] = jnp.maximum(jnp.dot(hsel_ref[0], pw, preferred_element_type=f32),
                             jnp.dot(hsel_ref[1], pw, preferred_element_type=f32))


def _banded_weights(wk, w_size):
    # wk: (3, 3, cin, cout) -> (3, w*cin, w*cout).
    # band[dy][(w', ci), (w, co)] = wk[dy, w'-w+1, ci, co] for |w'-w| <= 1.
    # Out-of-range taps simply have no band entry -> implicit zero W-padding.
    i = jnp.arange(w_size)
    cin, cout = wk.shape[2], wk.shape[3]
    bands = []
    for dy in range(3):
        b = jnp.zeros((w_size * cin, w_size * cout), jnp.float32)
        for dx in range(3):
            sel = (i[:, None] == i[None, :] + (dx - 1)).astype(jnp.float32)
            b = b + jnp.kron(sel, wk[dy, dx])
        bands.append(b)
    return jnp.stack(bands)


def _pool_selectors(n, h, w, cout):
    hh, wh = h // 2, w // 2
    eye_c = jnp.eye(cout, dtype=jnp.float32)
    w_even = (jnp.arange(w)[:, None] == 2 * jnp.arange(wh)[None, :]).astype(jnp.float32)
    w_odd = (jnp.arange(w)[:, None] == 2 * jnp.arange(wh)[None, :] + 1).astype(jnp.float32)
    wsel = jnp.stack([jnp.kron(w_even, eye_c), jnp.kron(w_odd, eye_c)])  # (2, W*C, Wh*C)
    eye_n = jnp.eye(n, dtype=jnp.float32)
    h_even = (2 * jnp.arange(hh)[:, None] == jnp.arange(h)[None, :]).astype(jnp.float32)
    h_odd = (2 * jnp.arange(hh)[:, None] + 1 == jnp.arange(h)[None, :]).astype(jnp.float32)
    hsel = jnp.stack([jnp.kron(eye_n, h_even), jnp.kron(eye_n, h_odd)])  # (2, N*Hh, N*H)
    return wsel, hsel


def _vmem_limit_bytes(buf_bytes):
    # v7x has 64 MiB/TC (v5e/v6e: 128 MiB): cap at ~80% of the reported capacity and
    # otherwise size from the actual resident buffers plus headroom for temps.
    try:
        cap = int(0.8 * pltpu.get_tpu_info().vmem_capacity_bytes)
    except Exception:
        cap = 48 * 1024 * 1024
    return int(min(cap, max(4 * 1024 * 1024, 8 * buf_bytes)))


@jax.jit
def vgg_block_pallas(x_nchw, w1, b1, g1, be1, w2, b2, g2, be2):
    """x_nchw: (N, Cin, H, W); conv weights in PyTorch OIHW layout (Cout, Cin, 3, 3)."""
    N, Cin, H, W = x_nchw.shape
    Cout = w1.shape[0]
    assert H % 2 == 0 and W % 2 == 0, "MaxPool2d(2) expects even H, W"
    Hh, Wh = H // 2, W // 2
    WC = W * Cout

    # Lane-dense layout: (N, H(+pad), W*C).  Only H is physically padded; W padding
    # is implicit in the banded weights.
    x = jnp.transpose(x_nchw, (0, 2, 3, 1)).astype(jnp.float32)        # NHWC
    xh = jnp.pad(x.reshape(N, H, W * Cin), ((0, 0), (1, 1), (0, 0)))   # (N, H+2, W*Cin)

    w1k = jnp.transpose(w1, (2, 3, 1, 0)).astype(jnp.float32)          # (3,3,Cin,Cout)
    w2k = jnp.transpose(w2, (2, 3, 1, 0)).astype(jnp.float32)          # (3,3,Cout,Cout)
    band1 = _banded_weights(w1k, W)                                    # (3, W*Cin, WC)
    band2 = _banded_weights(w2k, W)                                    # (3, WC, WC)
    gsum = jnp.kron(jnp.ones((W, W), jnp.float32), jnp.eye(Cout, dtype=jnp.float32))

    def pack(b, g, be):   # rows: conv bias / gamma / beta, each tiled to W*Cout lanes
        return jnp.stack([jnp.tile(v.astype(jnp.float32), W) for v in (b, g, be)])

    p1, p2 = pack(b1, g1, be1), pack(b2, g2, be2)
    wsel, hsel = _pool_selectors(N, H, W, Cout)

    buf_bytes = 4 * (xh.size + band1.size + band2.size + gsum.size + p1.size + p2.size
                     + wsel.size + hsel.size + N * (H + 2) * WC + N * Hh * Wh * Cout)

    out2d = pl.pallas_call(
        functools.partial(_vgg_block_kernel, n_spatial=N * H * W),
        out_shape=jax.ShapeDtypeStruct((N * Hh, Wh * Cout), jnp.float32),
        in_specs=[pl.BlockSpec(memory_space=pltpu.MemorySpace.VMEM)] * 8,
        out_specs=pl.BlockSpec(memory_space=pltpu.MemorySpace.VMEM),
        scratch_shapes=[pltpu.VMEM((N, H + 2, WC), jnp.float32)],      # H-padded y1
        compiler_params=pltpu.CompilerParams(
            vmem_limit_bytes=_vmem_limit_bytes(buf_bytes)),
    )(xh, band1, band2, gsum, p1, p2, wsel, hsel)

    out = out2d.reshape(N, Hh, Wh, Cout)
    return jnp.transpose(out, (0, 3, 1, 2))                            # back to NCHW


def vgg_block_reference(x_nchw, w1, b1, g1, be1, w2, b2, g2, be2):
    """Pure-XLA reference mirroring the PyTorch forward (training-mode BN)."""
    hp = jax.lax.Precision.HIGHEST

    def conv(x, w, b):
        y = jax.lax.conv_general_dilated(
            x, w, window_strides=(1, 1), padding=((1, 1), (1, 1)),
            dimension_numbers=("NCHW", "OIHW", "NCHW"), precision=hp)
        return y + b[None, :, None, None]

    def bn(x, g, be):
        mean = x.mean(axis=(0, 2, 3), keepdims=True)
        var = ((x - mean) ** 2).mean(axis=(0, 2, 3), keepdims=True)
        return (x - mean) * jax.lax.rsqrt(var + EPS) * g[None, :, None, None] \
            + be[None, :, None, None]

    y = jax.nn.relu(bn(conv(x_nchw, w1, b1), g1, be1))
    y = jax.nn.relu(bn(conv(y, w2, b2), g2, be2))
    N, C, H, W = y.shape
    return y.reshape(N, C, H // 2, 2, W // 2, 2).max(axis=(3, 5))


if __name__ == "__main__":
    N, Cin, Cout, H, W = 2, 4, 8, 16, 16
    keys = jax.random.split(jax.random.PRNGKey(0), 9)

    x = jax.random.normal(keys[0], (N, Cin, H, W), jnp.float32)
    w1 = 0.1 * jax.random.normal(keys[1], (Cout, Cin, 3, 3), jnp.float32)
    b1 = 0.1 * jax.random.normal(keys[2], (Cout,), jnp.float32)
    g1 = 1.0 + 0.1 * jax.random.normal(keys[3], (Cout,), jnp.float32)
    be1 = 0.1 * jax.random.normal(keys[4], (Cout,), jnp.float32)
    w2 = 0.1 * jax.random.normal(keys[5], (Cout, Cout, 3, 3), jnp.float32)
    b2 = 0.1 * jax.random.normal(keys[6], (Cout,), jnp.float32)
    g2 = 1.0 + 0.1 * jax.random.normal(keys[7], (Cout,), jnp.float32)
    be2 = 0.1 * jax.random.normal(keys[8], (Cout,), jnp.float32)

    out = jax.block_until_ready(vgg_block_pallas(x, w1, b1, g1, be1, w2, b2, g2, be2))
    ref = vgg_block_reference(x, w1, b1, g1, be1, w2, b2, g2, be2)

    assert out.shape == (N, Cout, H // 2, W // 2), out.shape
    # Tolerance also covers the case where f32 MXU matmuls run at DEFAULT precision
    # (bf16 passes); with true-f32 matmul lowering the observed diff is ~1e-5.
    assert jnp.allclose(out, ref, atol=3e-2, rtol=3e-2), \
        float(jnp.max(jnp.abs(out - ref)))

    print("KERNEL_OK")
</pallas_src>

<mosaic_0001>
module attributes {stable_mosaic.version = 11 : i64} {
  func.func @_vgg_block_kernel(%arg0: memref<2x18x64xf32, #tpu.memory_space<vmem>>, %arg1: memref<3x64x128xf32, #tpu.memory_space<vmem>>, %arg2: memref<3x128x128xf32, #tpu.memory_space<vmem>>, %arg3: memref<128x128xf32, #tpu.memory_space<vmem>>, %arg4: memref<3x128xf32, #tpu.memory_space<vmem>>, %arg5: memref<3x128xf32, #tpu.memory_space<vmem>>, %arg6: memref<2x128x64xf32, #tpu.memory_space<vmem>>, %arg7: memref<2x16x32xf32, #tpu.memory_space<vmem>>, %arg8: memref<16x64xf32, #tpu.memory_space<vmem>>, %arg9: memref<2x18x128xf32, #tpu.memory_space<vmem>>) attributes {dimension_semantics = [], scalar_prefetch = 0 : i64, scratch_operands = 1 : i64, tpu.core_type = #tpu.core_type<tc>} {
    %cst = arith.constant 0.000000e+00 : f32
    %0 = vector.broadcast %cst : f32 to vector<32x128xf32>
    %c0 = arith.constant 0 : index
    %c0_0 = arith.constant 0 : index
    %c0_1 = arith.constant 0 : index
    %1 = vector.load %arg0[%c0, %c0_0, %c0_1] : memref<2x18x64xf32, #tpu.memory_space<vmem>>, vector<2x16x64xf32>
    %2 = vector.shape_cast %1 : vector<2x16x64xf32> to vector<32x64xf32>
    %c0_2 = arith.constant 0 : index
    %c0_3 = arith.constant 0 : index
    %c0_4 = arith.constant 0 : index
    %3 = vector.load %arg1[%c0_2, %c0_3, %c0_4] : memref<3x64x128xf32, #tpu.memory_space<vmem>>, vector<1x64x128xf32>
    %4 = vector.shape_cast %3 : vector<1x64x128xf32> to vector<64x128xf32>
    %cst_5 = arith.constant dense<0.000000e+00> : vector<32x128xf32>
    %5 = tpu.matmul %2, %4, %cst_5 {dimension_numbers = #tpu.dot_dimension_numbers<[1], [0], [0], [1], [0, 0, 1, 1], [], []>} : vector<32x64xf32>, vector<64x128xf32>, vector<32x128xf32> -> vector<32x128xf32>
    %6 = arith.addf %0, %5 : vector<32x128xf32>
    %c0_6 = arith.constant 0 : index
    %c1 = arith.constant 1 : index
    %c0_7 = arith.constant 0 : index
    %7 = vector.load %arg0[%c0_6, %c1, %c0_7] : memref<2x18x64xf32, #tpu.memory_space<vmem>>, vector<2x16x64xf32>
    %8 = vector.shape_cast %7 : vector<2x16x64xf32> to vector<32x64xf32>
    %c1_8 = arith.constant 1 : index
    %c0_9 = arith.constant 0 : index
    %c0_10 = arith.constant 0 : index
    %9 = vector.load %arg1[%c1_8, %c0_9, %c0_10] : memref<3x64x128xf32, #tpu.memory_space<vmem>>, vector<1x64x128xf32>
    %10 = vector.shape_cast %9 : vector<1x64x128xf32> to vector<64x128xf32>
    %cst_11 = arith.constant dense<0.000000e+00> : vector<32x128xf32>
    %11 = tpu.matmul %8, %10, %cst_11 {dimension_numbers = #tpu.dot_dimension_numbers<[1], [0], [0], [1], [0, 0, 1, 1], [], []>} : vector<32x64xf32>, vector<64x128xf32>, vector<32x128xf32> -> vector<32x128xf32>
    %12 = arith.addf %6, %11 : vector<32x128xf32>
    %c0_12 = arith.constant 0 : index
    %c2 = arith.constant 2 : index
    %c0_13 = arith.constant 0 : index
    %13 = vector.load %arg0[%c0_12, %c2, %c0_13] : memref<2x18x64xf32, #tpu.memory_space<vmem>>, vector<2x16x64xf32>
    %14 = vector.shape_cast %13 : vector<2x16x64xf32> to vector<32x64xf32>
    %c2_14 = arith.constant 2 : index
    %c0_15 = arith.constant 0 : index
    %c0_16 = arith.constant 0 : index
    %15 = vector.load %arg1[%c2_14, %c0_15, %c0_16] : memref<3x64x128xf32, #tpu.memory_space<vmem>>, vector<1x64x128xf32>
    %16 = vector.shape_cast %15 : vector<1x64x128xf32> to vector<64x128xf32>
    %cst_17 = arith.constant dense<0.000000e+00> : vector<32x128xf32>
    %17 = tpu.matmul %14, %16, %cst_17 {dimension_numbers = #tpu.dot_dimension_numbers<[1], [0], [0], [1], [0, 0, 1, 1], [], []>} : vector<32x64xf32>, vector<64x128xf32>, vector<32x128xf32> -> vector<32x128xf32>
    %18 = arith.addf %12, %17 : vector<32x128xf32>
    %c0_18 = arith.constant 0 : index
    %c0_19 = arith.constant 0 : index
    %19 = vector.load %arg4[%c0_18, %c0_19] : memref<3x128xf32, #tpu.memory_space<vmem>>, vector<1x128xf32>
    %20 = vector.broadcast %19 : vector<1x128xf32> to vector<32x128xf32>
    %21 = arith.addf %18, %20 : vector<32x128xf32>
    %cst_20 = arith.constant dense<0.000000e+00> : vector<128xf32>
    %22 = vector.multi_reduction <add>, %21, %cst_20 [0] : vector<32x128xf32> to vector<128xf32>
    %23 = vector.shape_cast %22 : vector<128xf32> to vector<1x128xf32>
    %c0_21 = arith.constant 0 : index
    %c0_22 = arith.constant 0 : index
    %24 = vector.load %arg3[%c0_21, %c0_22] : memref<128x128xf32, #tpu.memory_space<vmem>>, vector<128x128xf32>
    %cst_23 = arith.constant dense<0.000000e+00> : vector<1x128xf32>
    %25 = tpu.matmul %23, %24, %cst_23 {dimension_numbers = #tpu.dot_dimension_numbers<[1], [0], [0], [1], [0, 0, 1, 1], [], []>} : vector<1x128xf32>, vector<128x128xf32>, vector<1x128xf32> -> vector<1x128xf32>
    %cst_24 = arith.constant 0.001953125 : f32
    %26 = vector.broadcast %cst_24 : f32 to vector<1x128xf32>
    %27 = arith.mulf %25, %26 : vector<1x128xf32>
    %28 = vector.broadcast %27 : vector<1x128xf32> to vector<32x128xf32>
    %29 = arith.subf %21, %28 : vector<32x128xf32>
    %30 = arith.mulf %29, %29 : vector<32x128xf32>
    %cst_25 = arith.constant dense<0.000000e+00> : vector<128xf32>
    %31 = vector.multi_reduction <add>, %30, %cst_25 [0] : vector<32x128xf32> to vector<128xf32>
    %32 = vector.shape_cast %31 : vector<128xf32> to vector<1x128xf32>
    %c0_26 = arith.constant 0 : index
    %c0_27 = arith.constant 0 : index
    %33 = vector.load %arg3[%c0_26, %c0_27] : memref<128x128xf32, #tpu.memory_space<vmem>>, vector<128x128xf32>
    %cst_28 = arith.constant dense<0.000000e+00> : vector<1x128xf32>
    %34 = tpu.matmul %32, %33, %cst_28 {dimension_numbers = #tpu.dot_dimension_numbers<[1], [0], [0], [1], [0, 0, 1, 1], [], []>} : vector<1x128xf32>, vector<128x128xf32>, vector<1x128xf32> -> vector<1x128xf32>
    %cst_29 = arith.constant 0.001953125 : f32
    %35 = vector.broadcast %cst_29 : f32 to vector<1x128xf32>
    %36 = arith.mulf %34, %35 : vector<1x128xf32>
    %c1_30 = arith.constant 1 : index
    %c0_31 = arith.constant 0 : index
    %37 = vector.load %arg4[%c1_30, %c0_31] : memref<3x128xf32, #tpu.memory_space<vmem>>, vector<1x128xf32>
    %cst_32 = arith.constant 9.99999974E-6 : f32
    %38 = vector.broadcast %cst_32 : f32 to vector<1x128xf32>
    %39 = arith.addf %36, %38 : vector<1x128xf32>
    %40 = math.rsqrt %39 : vector<1x128xf32>
    %41 = arith.mulf %37, %40 : vector<1x128xf32>
    %42 = vector.broadcast %41 : vector<1x128xf32> to vector<32x128xf32>
    %43 = arith.mulf %29, %42 : vector<32x128xf32>
    %c2_33 = arith.constant 2 : index
    %c0_34 = arith.constant 0 : index
    %44 = vector.load %arg4[%c2_33, %c0_34] : memref<3x128xf32, #tpu.memory_space<vmem>>, vector<1x128xf32>
    %45 = vector.broadcast %44 : vector<1x128xf32> to vector<32x128xf32>
    %46 = arith.addf %43, %45 : vector<32x128xf32>
    %cst_35 = arith.constant 0.000000e+00 : f32
    %47 = vector.broadcast %cst_35 : f32 to vector<32x128xf32>
    %48 = arith.maximumf %46, %47 : vector<32x128xf32>
    %cst_36 = arith.constant 0.000000e+00 : f32
    %49 = vector.broadcast %cst_36 : f32 to vector<2x1x128xf32>
    %50 = vector.shape_cast %48 : vector<32x128xf32> to vector<2x16x128xf32>
    %51 = tpu.concatenate %49, %50, %49 in 1 : vector<2x1x128xf32>, vector<2x16x128xf32>, vector<2x1x128xf32> -> vector<2x18x128xf32>
    %c0_37 = arith.constant 0 : index
    %c0_38 = arith.constant 0 : index
    %c0_39 = arith.constant 0 : index
    %52 = vector.load %arg9[%c0_37, %c0_38, %c0_39] : memref<2x18x128xf32, #tpu.memory_space<vmem>>, vector<2x18x128xf32>
    tpu.vector_store %arg9[%c0_37, %c0_38, %c0_39], %51 {strides = array<i32>} : memref<2x18x128xf32, #tpu.memory_space<vmem>>, vector<2x18x128xf32>,
    %cst_40 = arith.constant 0.000000e+00 : f32
    %53 = vector.broadcast %cst_40 : f32 to vector<32x128xf32>
    %c0_41 = arith.constant 0 : index
    %c0_42 = arith.constant 0 : index
    %c0_43 = arith.constant 0 : index
    %54 = vector.load %arg9[%c0_41, %c0_42, %c0_43] : memref<2x18x128xf32, #tpu.memory_space<vmem>>, vector<2x16x128xf32>
    %55 = vector.shape_cast %54 : vector<2x16x128xf32> to vector<32x128xf32>
    %c0_44 = arith.constant 0 : index
    %c0_45 = arith.constant 0 : index
    %c0_46 = arith.constant 0 : index
    %56 = vector.load %arg2[%c0_44, %c0_45, %c0_46] : memref<3x128x128xf32, #tpu.memory_space<vmem>>, vector<1x128x128xf32>
    %57 = vector.shape_cast %56 : vector<1x128x128xf32> to vector<128x128xf32>
    %cst_47 = arith.constant dense<0.000000e+00> : vector<32x128xf32>
    %58 = tpu.matmul %55, %57, %cst_47 {dimension_numbers = #tpu.dot_dimension_numbers<[1], [0], [0], [1], [0, 0, 1, 1], [], []>} : vector<32x128xf32>, vector<128x128xf32>, vector<32x128xf32> -> vector<32x128xf32>
    %59 = arith.addf %53, %58 : vector<32x128xf32>
    %c0_48 = arith.constant 0 : index
    %c1_49 = arith.constant 1 : index
    %c0_50 = arith.constant 0 : index
    %60 = vector.load %arg9[%c0_48, %c1_49, %c0_50] : memref<2x18x128xf32, #tpu.memory_space<vmem>>, vector<2x16x128xf32>
    %61 = vector.shape_cast %60 : vector<2x16x128xf32> to vector<32x128xf32>
    %c1_51 = arith.constant 1 : index
    %c0_52 = arith.constant 0 : index
    %c0_53 = arith.constant 0 : index
    %62 = vector.load %arg2[%c1_51, %c0_52, %c0_53] : memref<3x128x128xf32, #tpu.memory_space<vmem>>, vector<1x128x128xf32>
    %63 = vector.shape_cast %62 : vector<1x128x128xf32> to vector<128x128xf32>
    %cst_54 = arith.constant dense<0.000000e+00> : vector<32x128xf32>
    %64 = tpu.matmul %61, %63, %cst_54 {dimension_numbers = #tpu.dot_dimension_numbers<[1], [0], [0], [1], [0, 0, 1, 1], [], []>} : vector<32x128xf32>, vector<128x128xf32>, vector<32x128xf32> -> vector<32x128xf32>
    %65 = arith.addf %59, %64 : vector<32x128xf32>
    %c0_55 = arith.constant 0 : index
    %c2_56 = arith.constant 2 : index
    %c0_57 = arith.constant 0 : index
    %66 = vector.load %arg9[%c0_55, %c2_56, %c0_57] : memref<2x18x128xf32, #tpu.memory_space<vmem>>, vector<2x16x128xf32>
    %67 = vector.shape_cast %66 : vector<2x16x128xf32> to vector<32x128xf32>
    %c2_58 = arith.constant 2 : index
    %c0_59 = arith.constant 0 : index
    %c0_60 = arith.constant 0 : index
    %68 = vector.load %arg2[%c2_58, %c0_59, %c0_60] : memref<3x128x128xf32, #tpu.memory_space<vmem>>, vector<1x128x128xf32>
    %69 = vector.shape_cast %68 : vector<1x128x128xf32> to vector<128x128xf32>
    %cst_61 = arith.constant dense<0.000000e+00> : vector<32x128xf32>
    %70 = tpu.matmul %67, %69, %cst_61 {dimension_numbers = #tpu.dot_dimension_numbers<[1], [0], [0], [1], [0, 0, 1, 1], [], []>} : vector<32x128xf32>, vector<128x128xf32>, vector<32x128xf32> -> vector<32x128xf32>
    %71 = arith.addf %65, %70 : vector<32x128xf32>
    %c0_62 = arith.constant 0 : index
    %c0_63 = arith.constant 0 : index
    %72 = vector.load %arg5[%c0_62, %c0_63] : memref<3x128xf32, #tpu.memory_space<vmem>>, vector<1x128xf32>
    %73 = vector.broadcast %72 : vector<1x128xf32> to vector<32x128xf32>
    %74 = arith.addf %71, %73 : vector<32x128xf32>
    %cst_64 = arith.constant dense<0.000000e+00> : vector<128xf32>
    %75 = vector.multi_reduction <add>, %74, %cst_64 [0] : vector<32x128xf32> to vector<128xf32>
    %76 = vector.shape_cast %75 : vector<128xf32> to vector<1x128xf32>
    %c0_65 = arith.constant 0 : index
    %c0_66 = arith.constant 0 : index
    %77 = vector.load %arg3[%c0_65, %c0_66] : memref<128x128xf32, #tpu.memory_space<vmem>>, vector<128x128xf32>
    %cst_67 = arith.constant dense<0.000000e+00> : vector<1x128xf32>
    %78 = tpu.matmul %76, %77, %cst_67 {dimension_numbers = #tpu.dot_dimension_numbers<[1], [0], [0], [1], [0, 0, 1, 1], [], []>} : vector<1x128xf32>, vector<128x128xf32>, vector<1x128xf32> -> vector<1x128xf32>
    %cst_68 = arith.constant 0.001953125 : f32
    %79 = vector.broadcast %cst_68 : f32 to vector<1x128xf32>
    %80 = arith.mulf %78, %79 : vector<1x128xf32>
    %81 = vector.broadcast %80 : vector<1x128xf32> to vector<32x128xf32>
    %82 = arith.subf %74, %81 : vector<32x128xf32>
    %83 = arith.mulf %82, %82 : vector<32x128xf32>
    %cst_69 = arith.constant dense<0.000000e+00> : vector<128xf32>
    %84 = vector.multi_reduction <add>, %83, %cst_69 [0] : vector<32x128xf32> to vector<128xf32>
    %85 = vector.shape_cast %84 : vector<128xf32> to vector<1x128xf32>
    %c0_70 = arith.constant 0 : index
    %c0_71 = arith.constant 0 : index
    %86 = vector.load %arg3[%c0_70, %c0_71] : memref<128x128xf32, #tpu.memory_space<vmem>>, vector<128x128xf32>
    %cst_72 = arith.constant dense<0.000000e+00> : vector<1x128xf32>
    %87 = tpu.matmul %85, %86, %cst_72 {dimension_numbers = #tpu.dot_dimension_numbers<[1], [0], [0], [1], [0, 0, 1, 1], [], []>} : vector<1x128xf32>, vector<128x128xf32>, vector<1x128xf32> -> vector<1x128xf32>
    %cst_73 = arith.constant 0.001953125 : f32
    %88 = vector.broadcast %cst_73 : f32 to vector<1x128xf32>
    %89 = arith.mulf %87, %88 : vector<1x128xf32>
    %c1_74 = arith.constant 1 : index
    %c0_75 = arith.constant 0 : index
    %90 = vector.load %arg5[%c1_74, %c0_75] : memref<3x128xf32, #tpu.memory_space<vmem>>, vector<1x128xf32>
    %cst_76 = arith.constant 9.99999974E-6 : f32
    %91 = vector.broadcast %cst_76 : f32 to vector<1x128xf32>
    %92 = arith.addf %89, %91 : vector<1x128xf32>
    %93 = math.rsqrt %92 : vector<1x128xf32>
    %94 = arith.mulf %90, %93 : vector<1x128xf32>
    %95 = vector.broadcast %94 : vector<1x128xf32> to vector<32x128xf32>
    %96 = arith.mulf %82, %95 : vector<32x128xf32>
    %c2_77 = arith.constant 2 : index
    %c0_78 = arith.constant 0 : index
    %97 = vector.load %arg5[%c2_77, %c0_78] : memref<3x128xf32, #tpu.memory_space<vmem>>, vector<1x128xf32>
    %98 = vector.broadcast %97 : vector<1x128xf32> to vector<32x128xf32>
    %99 = arith.addf %96, %98 : vector<32x128xf32>
    %cst_79 = arith.constant 0.000000e+00 : f32
    %100 = vector.broadcast %cst_79 : f32 to vector<32x128xf32>
    %101 = arith.maximumf %99, %100 : vector<32x128xf32>
    %c0_80 = arith.constant 0 : index
    %c0_81 = arith.constant 0 : index
    %c0_82 = arith.constant 0 : index
    %102 = vector.load %arg6[%c0_80, %c0_81, %c0_82] : memref<2x128x64xf32, #tpu.memory_space<vmem>>, vector<1x128x64xf32>
    %103 = vector.shape_cast %102 : vector<1x128x64xf32> to vector<128x64xf32>
    %cst_83 = arith.constant dense<0.000000e+00> : vector<32x64xf32>
    %104 = tpu.matmul %101, %103, %cst_83 {dimension_numbers = #tpu.dot_dimension_numbers<[1], [0], [0], [1], [0, 0, 1, 1], [], []>} : vector<32x128xf32>, vector<128x64xf32>, vector<32x64xf32> -> vector<32x64xf32>
    %c1_84 = arith.constant 1 : index
    %c0_85 = arith.constant 0 : index
    %c0_86 = arith.constant 0 : index
    %105 = vector.load %arg6[%c1_84, %c0_85, %c0_86] : memref<2x128x64xf32, #tpu.memory_space<vmem>>, vector<1x128x64xf32>
    %106 = vector.shape_cast %105 : vector<1x128x64xf32> to vector<128x64xf32>
    %cst_87 = arith.constant dense<0.000000e+00> : vector<32x64xf32>
    %107 = tpu.matmul %101, %106, %cst_87 {dimension_numbers = #tpu.dot_dimension_numbers<[1], [0], [0], [1], [0, 0, 1, 1], [], []>} : vector<32x128xf32>, vector<128x64xf32>, vector<32x64xf32> -> vector<32x64xf32>
    %108 = arith.maximumf %104, %107 : vector<32x64xf32>
    %c0_88 = arith.constant 0 : index
    %c0_89 = arith.constant 0 : index
    %c0_90 = arith.constant 0 : index
    %109 = vector.load %arg7[%c0_88, %c0_89, %c0_90] : memref<2x16x32xf32, #tpu.memory_space<vmem>>, vector<1x16x32xf32>
    %110 = vector.shape_cast %109 : vector<1x16x32xf32> to vector<16x32xf32>
    %cst_91 = arith.constant dense<0.000000e+00> : vector<16x64xf32>
    %111 = tpu.matmul %110, %108, %cst_91 {dimension_numbers = #tpu.dot_dimension_numbers<[1], [0], [0], [1], [0, 0, 1, 1], [], []>} : vector<16x32xf32>, vector<32x64xf32>, vector<16x64xf32> -> vector<16x64xf32>
    %c1_92 = arith.constant 1 : index
    %c0_93 = arith.constant 0 : index
    %c0_94 = arith.constant 0 : index
    %112 = vector.load %arg7[%c1_92, %c0_93, %c0_94] : memref<2x16x32xf32, #tpu.memory_space<vmem>>, vector<1x16x32xf32>
    %113 = vector.shape_cast %112 : vector<1x16x32xf32> to vector<16x32xf32>
    %cst_95 = arith.constant dense<0.000000e+00> : vector<16x64xf32>
    %114 = tpu.matmul %113, %108, %cst_95 {dimension_numbers = #tpu.dot_dimension_numbers<[1], [0], [0], [1], [0, 0, 1, 1], [], []>} : vector<16x32xf32>, vector<32x64xf32>, vector<16x64xf32> -> vector<16x64xf32>
    %115 = arith.maximumf %111, %114 : vector<16x64xf32>
    %c0_96 = arith.constant 0 : index
    %c0_97 = arith.constant 0 : index
    %116 = vector.load %arg8[%c0_96, %c0_97] : memref<16x64xf32, #tpu.memory_space<vmem>>, vector<16x64xf32>
    tpu.vector_store %arg8[%c0_96, %c0_97], %115 {strides = array<i32>} : memref<16x64xf32, #tpu.memory_space<vmem>>, vector<16x64xf32>,
    return
  }
}

</mosaic_0001>

<bundles_post_ra>
// kernel: tile.33
= control target key start
LH: loop header
LB: loop body
LE: loop exit
PB: predicated region body
PF: predicated region fallthrough
CT: control target
= control target key end

     0   :  { %s28_s0 = inlined_call_operand.vmem [shape: f32[8], index: 0, kind: input, shape index: {}]   ;;  %s29_s1 = inlined_call_operand.vmem [shape: f32[16,8], index: 1, kind: output, shape index: {}]  }
   0x1   :  { %v4_v0 = vld [vmem:[%s28_s0] ss:$0 sm:$0xff] }
   0x2   :  { %5 = vst [vmem:[%s29_s1] sm:$0xff] %v4_v0  ;;  %8 = vst [vmem:[%s29_s1 + $0x8] sm:$0xff] %v4_v0 }

// kernel: tile.42
= control target key start
LH: loop header
LB: loop body
LE: loop exit
PB: predicated region body
PF: predicated region fallthrough
CT: control target
= control target key end

     0   :  { %s133_s10 = smov 120   ;;  %s134_s11 = smov 104   ;;  %vm3_vm0 = vcmask 64512   ;;  %vm9_vm1 = vcmask 1048512   ;;  %vm15_vm2 = vcmask 982912   ;;  %vm21_vm3 = vcmask 917312   ;;  %s209_s0 = inlined_call_operand.vmem [shape: f32[16,8], index: 0, kind: input, shape index: {}]   ;;  %s210_s1 = inlined_call_operand.vmem [shape: f32[1,128], index: 1, kind: output, shape index: {}]  }
   0x1   :  { %v103_v0 = vld [vmem:[%s209_s0 + $0xf] sm:$0x1]   ;;  %v105_v1 = vld [vmem:[%s209_s0 + $0xd] sm:$0x1]   ;;  %v104_v2 = vld [vmem:[%s209_s0 + $0xe] sm:$0x1]  }
   0x2   :  { %7 = vrot.lane.b32.xlu0 %v103_v0, %s133_s10  ;;  %19 = vrot.lane.b32.xlu1 %v105_v1, %s134_s11  ;;  %v106_v3 = vld [vmem:[%s209_s0 + $0xc] sm:$0x1]   ;;  %s135_s16 = smov 112   ;;  %s136_s17 = smov 96   ;;  %v107_v4 = vld [vmem:[%s209_s0 + $0xb] sm:$0x1]  }
   0x3   :  { %v108_v5 = vld [vmem:[%s209_s0 + $0xa] sm:$0x1]   ;;  %v2_v6 = vld [vmem:[%s209_s0] sm:$0x1]   ;;  %s137_s24 = smov 88   ;;  %s138_s25 = smov 80  }
   0x4   :  { %4 = vst.msk [vmem:[#allocation0] sm:$0x1] %vm3_vm0, %v2_v6   ;;  %v109_v7 = vld [vmem:[%s209_s0 + $0x9] sm:$0x1]   ;;  %v110_v8 = vld [vmem:[%s209_s0 + $0x8] sm:$0x1]  }
   0x5   :  { %s139_s30 = smov 72   ;;  %s140_s2 = smov 64   ;;  %v111_v9 = vld [vmem:[%s209_s0 + $0x7] sm:$0x1]   ;;  %v112_v10 = vld [vmem:[%s209_s0 + $0x6] sm:$0x1]  }
   0x6   :  { %13 = vrot.lane.b32.xlu0 %v104_v2, %s135_s16  ;;  %25 = vrot.lane.b32.xlu1 %v106_v3, %s136_s17  ;;  %s141_s7 = smov 56   ;;  %s142_s8 = smov 48   ;;  %v113_v11 = vld [vmem:[%s209_s0 + $0x5] sm:$0x1]   ;;  %v114_v12 = vld [vmem:[%s209_s0 + $0x4] sm:$0x1]  }
   0x7   :  { %s143_s13 = smov 40   ;;  %s144_s14 = smov 32   ;;  %v115_v13 = vld [vmem:[%s209_s0 + $0x3] sm:$0x1]   ;;  %v116_v14 = vld [vmem:[%s209_s0 + $0x2] sm:$0x1]  }
   0x8   :  { %s145_s19 = smov 24   ;;  %s146_s20 = smov 16   ;;  %v117_v15 = vld [vmem:[%s209_s0 + $0x1] sm:$0x1]   ;;  %vm27_vm4 = vcmask 851712   ;;  %vm33_vm5 = vcmask 786112  }
   0x9   :  { %s147_s0 = smov 8   ;;  %vm39_vm6 = vcmask 720512   ;;  %vm45_vm7 = vcmask 654912   ;;  %vm51_vm8 = vcmask 589312   ;;  %vm57_vm9 = vcmask 523712  }
   0xa   :  { %31 = vrot.lane.b32.xlu0 %v107_v4, %s137_s24  ;;  %37 = vrot.lane.b32.xlu1 %v108_v5, %s138_s25  ;;  %vm63_vm10 = vcmask 458112   ;;  %vm69_vm11 = vcmask 392512   ;;  %vm75_vm12 = vcmask 326912   ;;  %vm81_vm13 = vcmask 261312  }
   0xb   :  { %vm87_vm14 = vcmask 195712   ;;  %vm93_vm15 = vcmask 130112  }
   0xe   :  { %43 = vrot.lane.b32.xlu0 %v109_v7, %s139_s30  ;;  %49 = vrot.lane.b32.xlu1 %v110_v8, %s140_s2 }
  0x12   :  { %55 = vrot.lane.b32.xlu0 %v111_v9, %s141_s7  ;;  %61 = vrot.lane.b32.xlu1 %v112_v10, %s142_s8 }
  0x16   :  { %67 = vrot.lane.b32.xlu0 %v113_v11, %s143_s13  ;;  %73 = vrot.lane.b32.xlu1 %v114_v12, %s144_s14 }
  0x1a   :  { %79 = vrot.lane.b32.xlu0 %v115_v13, %s145_s19  ;;  %85 = vrot.lane.b32.xlu1 %v116_v14, %s146_s20 }
  0x1e   :  { %91 = vrot.lane.b32.xlu0 %v117_v15, %s147_s0 }
  0x74   :  { %v8_v16 = vpop.permute.xlu0 %7   ;;  %v20_v17 = vpop.permute.xlu1 %19  }
  0x75   :  { %10 = vst.msk [vmem:[#allocation0] sm:$0x1] %vm9_vm1, %v8_v16  }
  0x78   :  { %v14_v18 = vpop.permute.xlu0 %13   ;;  %v26_v19 = vpop.permute.xlu1 %25  }
  0x79   :  { %16 = vst.msk [vmem:[#allocation0] sm:$0x1] %vm15_vm2, %v14_v18  }
  0x7a   :  { %22 = vst.msk [vmem:[#allocation0] sm:$0x1] %vm21_vm3, %v20_v17  }
  0x7b   :  { %28 = vst.msk [vmem:[#allocation0] sm:$0x1] %vm27_vm4, %v26_v19  }
  0x7c   :  { %v32_v20 = vpop.permute.xlu0 %31   ;;  %v38_v21 = vpop.permute.xlu1 %37  }
  0x7d   :  { %34 = vst.msk [vmem:[#allocation0] sm:$0x1] %vm33_vm5, %v32_v20  }
  0x7e   :  { %40 = vst.msk [vmem:[#allocation0] sm:$0x1] %vm39_vm6, %v38_v21  }
  0x80   :  { %v44_v22 = vpop.permute.xlu0 %43   ;;  %v50_v23 = vpop.permute.xlu1 %49  }
  0x81   :  { %46 = vst.msk [vmem:[#allocation0] sm:$0x1] %vm45_vm7, %v44_v22  }
  0x82   :  { %52 = vst.msk [vmem:[#allocation0] sm:$0x1] %vm51_vm8, %v50_v23  }
  0x84   :  { %v56_v24 = vpop.permute.xlu0 %55   ;;  %v62_v25 = vpop.permute.xlu1 %61  }
  0x85   :  { %58 = vst.msk [vmem:[#allocation0] sm:$0x1] %vm57_vm9, %v56_v24  }
  0x86   :  { %64 = vst.msk [vmem:[#allocation0] sm:$0x1] %vm63_vm10, %v62_v25  }
  0x88   :  { %v68_v26 = vpop.permute.xlu0 %67   ;;  %v74_v27 = vpop.permute.xlu1 %73  }
  0x89   :  { %70 = vst.msk [vmem:[#allocation0] sm:$0x1] %vm69_vm11, %v68_v26  }
  0x8a   :  { %76 = vst.msk [vmem:[#allocation0] sm:$0x1] %vm75_vm12, %v74_v27  }
  0x8c   :  { %v80_v28 = vpop.permute.xlu0 %79   ;;  %v86_v29 = vpop.permute.xlu1 %85  }
  0x8d   :  { %82 = vst.msk [vmem:[#allocation0] sm:$0x1] %vm81_vm13, %v80_v28  }
  0x8e   :  { %88 = vst.msk [vmem:[#allocation0] sm:$0x1] %vm87_vm14, %v86_v29  }
  0x90   :  { %v92_v30 = vpop.permute.xlu0 %91  }
  0x91   :  { %94 = vst.msk [vmem:[#allocation0] sm:$0x1] %vm93_vm15, %v92_v30  }
  0x98   :  { %v99_v31 = vld [vmem:[#allocation0] sm:$0x1] }
  0x99   :  { %102 = vst [vmem:[%s210_s1] sm:$0x1] %v99_v31 }

// kernel: vgg_block_pallas.1
= control target key start
LH: loop header
LB: loop body
LE: loop exit
PB: predicated region body
PF: predicated region fallthrough
CT: control target
= control target key end

     0   :  { %vm54_vm0 = vcmask 523264   ;;  %v2268_v36 = vmov 0.0   ;;  %vm2269_vm1 = vmmov 0   ;;  %vm589_vm2 = vcmask 1040384   ;;  %s2979_s1 = inlined_call_operand.vmem [shape: f32[3,64,128], index: 1, kind: input, shape index: {}]   ;;  %s2980_s0 = inlined_call_operand.vmem [shape: f32[2,18,64], index: 0, kind: input, shape index: {}]   ;;  %s2981_s3 = inlined_call_operand.vmem [shape: f32[128,128], index: 3, kind: input, shape index: {}]   ;;  %s2982_s4 = inlined_call_operand.vmem [shape: f32[3,128], index: 4, kind: input, shape index: {}]   ;;  %s2983_s2 = inlined_call_operand.vmem [shape: f32[3,128,128], index: 2, kind: input, shape index: {}]   ;;  %s2984_s5 = inlined_call_operand.vmem [shape: f32[3,128], index: 5, kind: input, shape index: {}]   ;;  %s2985_s6 = inlined_call_operand.vmem [shape: f32[2,128,64], index: 6, kind: input, shape index: {}]   ;;  %s2986_s7 = inlined_call_operand.vmem [shape: f32[2,16,32], index: 7, kind: input, shape index: {}]   ;;  %s2987_s8 = inlined_call_operand.vmem [shape: f32[16,64], index: 8, kind: output, shape index: {}]  }
   0x1   :  { %v1545_v0 = vld [vmem:[%s2979_s1 + $0x78] sm:$0xff]  ;;  %v1544_v2 = vld [vmem:[%s2979_s1 + $0x70] sm:$0xff]  ;;  %v1543_v4 = vld [vmem:[%s2979_s1 + $0x68] sm:$0xff]  ;;  %vm1364_vm4 = vcmask 261120  }
   0x2   :  { %v40_v1 = vld [vmem:[%s2979_s1 + $0x38] sm:$0xff]  ;;  %1840 = vmatprep.subr.mxu0 %v1545_v0  ;;  %v39_v3 = vld [vmem:[%s2979_s1 + $0x30] sm:$0xff]  ;;  %v38_v5 = vld [vmem:[%s2979_s1 + $0x28] sm:$0xff] }
   0x3   :  { %1862 = vmatprep.subr.mxu1 %v40_v1  ;;  %1841 = vmatpush3.msra.mxu0 %v1545_v0  ;;  %v1542_v6 = vld [vmem:[%s2979_s1 + $0x60] sm:$0xff]  ;;  %v1541_v8 = vld [vmem:[%s2979_s1 + $0x58] sm:$0xff]  ;;  %v1540_v10 = vld [vmem:[%s2979_s1 + $0x50] sm:$0xff] }
   0x4   :  { %1863 = vmatpush3.msra.mxu1 %v40_v1  ;;  %1842 = vmatprep.subr.mxu0 %v1544_v2  ;;  %v37_v7 = vld [vmem:[%s2979_s1 + $0x20] sm:$0xff]  ;;  %v36_v9 = vld [vmem:[%s2979_s1 + $0x18] sm:$0xff]  ;;  %v35_v11 = vld [vmem:[%s2979_s1 + $0x10] sm:$0xff] }
   0x5   :  { %1864 = vmatprep.subr.mxu1 %v39_v3  ;;  %1843 = vmatpush3.msra.mxu0 %v1544_v2  ;;  %v1539_v12 = vld [vmem:[%s2979_s1 + $0x48] sm:$0xff]  ;;  %v1538_v14 = vld [vmem:[%s2979_s1 + $0x40] sm:$0xff]  ;;  %v1561_v20 = vld [vmem:[%s2979_s1 + $0xb8] sm:$0xff] }
   0x6   :  { %1865 = vmatpush3.msra.mxu1 %v39_v3  ;;  %1844 = vmatprep.subr.mxu0 %v1543_v4  ;;  %v34_v13 = vld [vmem:[%s2979_s1 + $0x8] sm:$0xff]  ;;  %v33_v15 = vld [vmem:[%s2979_s1] sm:$0xff]  ;;  %v31_v22 = vld [vmem:[%s2980_s0 + $0x18] sm:$0xff] }
   0x7   :  { %1866 = vmatprep.subr.mxu1 %v38_v5  ;;  %1845 = vmatpush3.msra.mxu0 %v1543_v4  ;;  %v41_v16 = vld [vmem:[%s2980_s0 + $0x1] sm:$0xff]  ;;  %v42_v18 = vld [vmem:[%s2980_s0 + $0x9] sm:$0xff]  ;;  %v43_v21 = vld [vmem:[%s2980_s0 + $0x19] sm:$0xff] }
   0x8   :  { %1867 = vmatpush3.msra.mxu1 %v38_v5  ;;  %1846 = vmatprep.subr.mxu0 %v1542_v6  ;;  %v29_v17 = vld [vmem:[%s2980_s0] sm:$0xff]  ;;  %v30_v19 = vld [vmem:[%s2980_s0 + $0x8] sm:$0xff]  ;;  %v1560_v23 = vld [vmem:[%s2979_s1 + $0xb0] sm:$0xff] }
   0x9   :  { %1868 = vmatprep.subr.mxu1 %v37_v7  ;;  %1847 = vmatpush3.msra.mxu0 %v1542_v6  ;;  %v32_v24 = vld [vmem:[%s2980_s0 + $0x20] sm:$0xff]  ;;  %v1559_v25 = vld [vmem:[%s2979_s1 + $0xa8] sm:$0xff]  ;;  %v1557_v29 = vld [vmem:[%s2979_s1 + $0x98] sm:$0xff] }
   0xa   :  { %1869 = vmatpush3.msra.mxu1 %v37_v7  ;;  %1848 = vmatprep.subr.mxu0 %v1541_v8  ;;  %v44_v26 = vld [vmem:[%s2980_s0 + $0x21] sm:$0xff]  ;;  %v1556_v30 = vld [vmem:[%s2979_s1 + $0x90] sm:$0xff]  ;;  %v2440_v37 = vld [vmem:[%s2981_s3 + $0x78] sm:$0xff] }
   0xb   :  { %1870 = vmatprep.subr.mxu1 %v36_v9  ;;  %1849 = vmatpush3.msra.mxu0 %v1541_v8  ;;  %v249_v27 = vld [vmem:[%s2980_s0 + $0x2] sm:$0xff]  ;;  %v250_v33 = vld [vmem:[%s2980_s0 + $0xa] sm:$0xff]  ;;  %v251_v34 = vld [vmem:[%s2980_s0 + $0x1a] sm:$0xff] }
   0xc   :  { %1871 = vmatpush3.msra.mxu1 %v36_v9  ;;  %1850 = vmatprep.subr.mxu0 %v1540_v10  ;;  %v1558_v28 = vld [vmem:[%s2979_s1 + $0xa0] sm:$0xff]  ;;  %v1555_v31 = vld [vmem:[%s2979_s1 + $0x88] sm:$0xff]  ;;  %v2445_v38 = vld [vmem:[%s2981_s3 + $0x70] sm:$0xff] }
   0xd   :  { %1872 = vmatprep.subr.mxu1 %v35_v11  ;;  %1851 = vmatpush3.msra.mxu0 %v1540_v10  ;;  %v1554_v32 = vld [vmem:[%s2979_s1 + $0x80] sm:$0xff]  ;;  %v2458_v39 = vld [vmem:[%s2981_s3 + $0x68] sm:$0xff]  ;;  %v2475_v41 = vld [vmem:[%s2981_s3 + $0x58] sm:$0xff] }
   0xe   :  { %1873 = vmatpush3.msra.mxu1 %v35_v11  ;;  %1852 = vmatprep.subr.mxu0 %v1539_v12  ;;  %v252_v35 = vld [vmem:[%s2980_s0 + $0x22] sm:$0xff]  ;;  %v2484_v42 = vld [vmem:[%s2981_s3 + $0x50] sm:$0xff]  ;;  %v2511_v45 = vld [vmem:[%s2981_s3 + $0x38] sm:$0xff] }
   0xf   :  { %1874 = vmatprep.subr.mxu1 %v34_v13  ;;  %1853 = vmatpush3.msra.mxu0 %v1539_v12  ;;  %v2466_v40 = vld [vmem:[%s2981_s3 + $0x60] sm:$0xff]  ;;  %v2493_v43 = vld [vmem:[%s2981_s3 + $0x48] sm:$0xff]  ;;  %v2520_v46 = vld [vmem:[%s2981_s3 + $0x30] sm:$0xff] }
  0x10   :  { %1875 = vmatpush3.msra.mxu1 %v34_v13  ;;  %1854 = vmatprep.subr.mxu0 %v1538_v14  ;;  %v2502_v44 = vld [vmem:[%s2981_s3 + $0x40] sm:$0xff]  ;;  %v2529_v47 = vld [vmem:[%s2981_s3 + $0x28] sm:$0xff]  ;;  %v2547_v49 = vld [vmem:[%s2981_s3 + $0x18] sm:$0xff] }
  0x11   :  { %1876 = vmatprep.subr.mxu1 %v33_v15  ;;  %1855 = vmatpush3.msra.mxu0 %v1538_v14  ;;  %v2538_v48 = vld [vmem:[%s2981_s3 + $0x20] sm:$0xff]  ;;  %v2556_v50 = vld [vmem:[%s2981_s3 + $0x10] sm:$0xff]  ;;  %v2565_v51 = vld [vmem:[%s2981_s3 + $0x8] sm:$0xff] }
  0x12   :  { %1856 = vmatprep.mubr.msk.f32.mxu0 %vm54_vm0, %v41_v16  ;;  %1877 = vmatpush3.msra.mxu1 %v33_v15  ;;  %v2570_v52 = vld [vmem:[%s2981_s3] sm:$0xff]  ;;  %vm2264_vm3 = vmneg %vm589_vm2 }
  0x13   :  { %1878 = vmatprep.mubr.msk.f32.mxu1 %vm54_vm0, %v29_v17  ;;  %1857 = vmatmul.mubr.msk.f32.vlgmr.msra.gmra.mxu0 %vm54_vm0, %v42_v18  ;;  %v1566_v3 = vld [vmem:[%s2982_s4] ss:$0 sm:$0xff] }
  0x14   :  { %1879 = vmatmul.mubr.msk.f32.vlgmr.msra.gmra.mxu1 %vm54_vm0, %v30_v19  ;;  %1884 = vmatprep.subr.mxu0 %v1561_v20 }
  0x15   :  { %1859 = vmatprep.mubr.msk.f32.mxu0 %vm54_vm0, %v43_v21  ;;  %1885 = vmatpush3.msra.mxu0 %v1561_v20 }
  0x16   :  { %1881 = vmatprep.mubr.msk.f32.mxu1 %vm54_vm0, %v31_v22  ;;  %1886 = vmatprep.subr.mxu0 %v1560_v23 }
  0x17   :  { %1887 = vmatpush3.msra.mxu0 %v1560_v23  ;;  %1906 = vmatprep.subr.mxu1 %v2268_v36  ;;  %v468_v23 = vlaneseq }
  0x18   :  { %1882 = vmatmul.mubr.msk.f32.gmra.mxu1 %vm54_vm0, %v32_v24  ;;  %1888 = vmatprep.subr.mxu0 %v1559_v25 }
  0x19   :  { %1860 = vmatmul.mubr.msk.f32.gmra.mxu0 %vm54_vm0, %v44_v26  ;;  %1907 = vmatpush3.msra.mxu1 %v2440_v37  ;;  %v469_v24 = vshrl.u32 %v468_v23, 7  ;;  %v618_v23 = vld [vmem:[%s2983_s2 + $0x10] sm:$0xff] }
  0x1a   :  { %1889 = vmatpush3.msra.mxu0 %v1559_v25  ;;  %1900 = vmatprep.mubr.msk.f32.mxu0 %vm54_vm0, %v249_v27 }
  0x1b   :  { %1890 = vmatprep.subr.mxu0 %v1558_v28  ;;  %1908 = vmatprep.subr.mxu1 %v2268_v36  ;;  %v2586_v25 = vsub.s32 0, %v469_v24  ;;  %v1573_v24 = vld [vmem:[%s2983_s2 + $0xa8] sm:$0xff] }
  0x1c   :  { %1891 = vmatpush3.msra.mxu0 %v1558_v28  ;;  %1909 = vmatpush3.msra.mxu1 %v2445_v38 }
  0x1d   :  { %1892 = vmatprep.subr.mxu0 %v1557_v29  ;;  %1910 = vmatprep.subr.mxu1 %v2268_v36 }
  0x1e   :  { %1893 = vmatpush3.msra.mxu0 %v1557_v29  ;;  %1911 = vmatpush3.msra.mxu1 %v2458_v39 }
  0x1f   :  { %1894 = vmatprep.subr.mxu0 %v1556_v30  ;;  %1912 = vmatprep.subr.mxu1 %v2268_v36 }
  0x20   :  { %1895 = vmatpush3.msra.mxu0 %v1556_v30  ;;  %1913 = vmatpush3.msra.mxu1 %v2466_v40 }
  0x21   :  { %1896 = vmatprep.subr.mxu0 %v1555_v31  ;;  %1914 = vmatprep.subr.mxu1 %v2268_v36 }
  0x22   :  { %1897 = vmatpush3.msra.mxu0 %v1555_v31  ;;  %1915 = vmatpush3.msra.mxu1 %v2475_v41 }
  0x23   :  { %1898 = vmatprep.subr.mxu0 %v1554_v32  ;;  %1916 = vmatprep.subr.mxu1 %v2268_v36 }
  0x24   :  { %1899 = vmatpush3.msra.mxu0 %v1554_v32  ;;  %1917 = vmatpush3.msra.mxu1 %v2484_v42 }
  0x25   :  { %1901 = vmatmul.mubr.msk.f32.vlgmr.msra.gmra.mxu0 %vm54_vm0, %v250_v33  ;;  %1941 = vmatprep.subr.mxu0 %v2268_v36 }
  0x26   :  { %1903 = vmatprep.mubr.msk.f32.mxu0 %vm54_vm0, %v251_v34  ;;  %1942 = vmatpush3.msra.mxu0 %v2440_v37 }
  0x27   :  { %1943 = vmatprep.subr.mxu0 %v2268_v36  ;;  %1918 = vmatprep.subr.mxu1 %v2268_v36 }
  0x28   :  { %1944 = vmatpush3.msra.mxu0 %v2445_v38  ;;  %1919 = vmatpush3.msra.mxu1 %v2493_v43 }
  0x29   :  { %1904 = vmatmul.mubr.msk.f32.gmra.mxu0 %vm54_vm0, %v252_v35  ;;  %1945 = vmatprep.subr.mxu0 %v2268_v36 }
  0x2a   :  { %1946 = vmatpush3.msra.mxu0 %v2458_v39  ;;  %1920 = vmatprep.subr.mxu1 %v2268_v36 }
  0x2b   :  { %1947 = vmatprep.subr.mxu0 %v2268_v36  ;;  %1921 = vmatpush3.msra.mxu1 %v2502_v44 }
  0x2c   :  { %1948 = vmatpush3.msra.mxu0 %v2466_v40  ;;  %1922 = vmatprep.subr.mxu1 %v2268_v36 }
  0x2d   :  { %1949 = vmatprep.subr.mxu0 %v2268_v36  ;;  %1923 = vmatpush3.msra.mxu1 %v2511_v45 }
  0x2e   :  { %1950 = vmatpush3.msra.mxu0 %v2475_v41  ;;  %1924 = vmatprep.subr.mxu1 %v2268_v36 }
  0x2f   :  { %1951 = vmatprep.subr.mxu0 %v2268_v36  ;;  %1925 = vmatpush3.msra.mxu1 %v2520_v46 }
  0x30   :  { %1952 = vmatpush3.msra.mxu0 %v2484_v42  ;;  %1926 = vmatprep.subr.mxu1 %v2268_v36 }
  0x31   :  { %1953 = vmatprep.subr.mxu0 %v2268_v36  ;;  %1927 = vmatpush3.msra.mxu1 %v2529_v47 }
  0x32   :  { %1954 = vmatpush3.msra.mxu0 %v2493_v43  ;;  %1928 = vmatprep.subr.mxu1 %v2268_v36 }
  0x33   :  { %1955 = vmatprep.subr.mxu0 %v2268_v36  ;;  %1929 = vmatpush3.msra.mxu1 %v2538_v48 }
  0x34   :  { %1956 = vmatpush3.msra.mxu0 %v2502_v44  ;;  %1930 = vmatprep.subr.mxu1 %v2268_v36 }
  0x35   :  { %1957 = vmatprep.subr.mxu0 %v2268_v36  ;;  %1931 = vmatpush3.msra.mxu1 %v2547_v49 }
  0x36   :  { %1958 = vmatpush3.msra.mxu0 %v2511_v45  ;;  %1932 = vmatprep.subr.mxu1 %v2268_v36 }
  0x37   :  { %1959 = vmatprep.subr.mxu0 %v2268_v36  ;;  %1933 = vmatpush3.msra.mxu1 %v2556_v50 }
  0x38   :  { %1960 = vmatpush3.msra.mxu0 %v2520_v46  ;;  %1934 = vmatprep.subr.mxu1 %v2268_v36 }
  0x39   :  { %1961 = vmatprep.subr.mxu0 %v2268_v36  ;;  %1935 = vmatpush3.msra.mxu1 %v2565_v51 }
  0x3a   :  { %1962 = vmatpush3.msra.mxu0 %v2529_v47  ;;  %1938 = vmatprep.mubr.msk.f32.mxu1 %vm2269_vm1, %v2268_v36 }
  0x3b   :  { %1963 = vmatprep.subr.mxu0 %v2268_v36  ;;  %1936 = vmatprep.subr.mxu1 %v2268_v36 }
  0x3c   :  { %1964 = vmatpush3.msra.mxu0 %v2538_v48  ;;  %1937 = vmatpush3.msra.mxu1 %v2570_v52 }
  0x3d   :  { %1965 = vmatprep.subr.mxu0 %v2268_v36  ;;  %1973 = vmatprep.mubr.msk.f32.mxu0 %vm2269_vm1, %v2268_v36 }
  0x3e   :  { %1966 = vmatpush3.msra.mxu0 %v2547_v49 }
  0x3f   :  { %1967 = vmatprep.subr.mxu0 %v2268_v36 }
  0x40   :  { %1968 = vmatpush3.msra.mxu0 %v2556_v50 }
  0x41   :  { %1969 = vmatprep.subr.mxu0 %v2268_v36 }
  0x42   :  { %1970 = vmatpush3.msra.mxu0 %v2565_v51 }
  0x43   :  { %1971 = vmatprep.subr.mxu0 %v2268_v36 }
  0x44   :  { %1972 = vmatpush3.msra.mxu0 %v2570_v52 }
  0xd3   :  { %v1858_v53 = vpop.f32.mrf.mxu0 }
  0xd4   :  { %v1880_v54 = vpop.f32.mrf.mxu1 }
  0xd5   :  { %v133_v55 = vpop.f32.mrf.mxu0  ;;  %v236_v61 = vadd.f32 %v1880_v54, %v1858_v53 }
  0xd6   :  { %v230_v57 = vpop.f32.mrf.mxu1 }
  0xd7   :  { %v231_v62 = vadd.f32 %v230_v57, %v133_v55 }
  0xd8   :  { %v1883_v58 = vpop.f32.mrf.mxu1 }
  0xd9   :  { %v1861_v56 = vpop.f32.mrf.mxu0 }
  0xda   :  { %v240_v63 = vpop.f32.mrf.mxu1  ;;  %v246_v5 = vadd.f32 %v1883_v58, %v1861_v56 }
  0xdb   :  { %v143_v59 = vpop.f32.mrf.mxu0 }
  0xdc   :  { %v241_v6 = vadd.f32 %v240_v63, %v143_v59 }
  0xe5   :  { %v1902_v60 = vpop.f32.mrf.mxu0 }
  0xe6   :  { %v360_v1 = vadd.f32 %v1902_v60, %v236_v61 }
  0xe7   :  { %v340_v0 = vpop.f32.mrf.mxu0 }
  0xe8   :  { %v359_v2 = vadd.f32 %v340_v0, %v231_v62  ;;  %v369_v9 = vadd.f32 %v1566_v3, %v360_v1  ;;  %v631_v0 = vld [vmem:[%s2983_s2 + $0x78] sm:$0xff]  ;;  %v630_v1 = vld [vmem:[%s2983_s2 + $0x70] sm:$0xff] }
  0xe9   :  { %v1905_v4 = vpop.f32.mrf.mxu0  ;;  %2014 = vmatprep.subr.mxu0 %v631_v0 }
  0xea   :  { %v368_v7 = vadd.f32 %v1566_v3, %v359_v2  ;;  %v362_v10 = vadd.f32 %v1905_v4, %v246_v5  ;;  %v629_v2 = vld [vmem:[%s2983_s2 + $0x68] sm:$0xff]  ;;  %v1583_v4 = vld [vmem:[%s2983_s2 + $0xf8] sm:$0xff] }
  0xeb   :  { %v350_v8 = vpop.f32.mrf.mxu0  ;;  %1976 = vmatprep.subr.mxu1 %v1583_v4  ;;  %v627_v5 = vld [vmem:[%s2983_s2 + $0x58] sm:$0xff] }
  0xec   :  { %v361_v11 = vadd.f32 %v350_v8, %v241_v6  ;;  %v372_v12 = vadd.f32 %v369_v9, %v368_v7  ;;  %v371_v14 = vadd.f32 %v1566_v3, %v362_v10  ;;  %v1582_v6 = vld [vmem:[%s2983_s2 + $0xf0] sm:$0xff]  ;;  %v1581_v8 = vld [vmem:[%s2983_s2 + $0xe8] sm:$0xff]  ;;  %v1580_v10 = vld [vmem:[%s2983_s2 + $0xe0] sm:$0xff] }
  0xee   :  { %v370_v13 = vadd.f32 %v1566_v3, %v361_v11  ;;  %v628_v3 = vld [vmem:[%s2983_s2 + $0x60] sm:$0xff] }
  0xef   :  { %v624_v11 = vld [vmem:[%s2983_s2 + $0x40] sm:$0xff] }
  0xf0   :  { %v373_v15 = vadd.f32 %v372_v12, %v370_v13  ;;  %v1579_v12 = vld [vmem:[%s2983_s2 + $0xd8] sm:$0xff] }
  0xf2   :  { %v374_v16 = vadd.f32 %v373_v15, %v371_v14  ;;  %v622_v15 = vld [vmem:[%s2983_s2 + $0x30] sm:$0xff] }
  0xf4   :  { %v375_v17 = vrot.slane %v374_v16, 4 }
  0xf6   :  { %v376_v18 = vadd.f32 %v375_v17, %v374_v16  ;;  %v1577_v16 = vld [vmem:[%s2983_s2 + $0xc8] sm:$0xff] }
  0xf7   :  { %v621_v17 = vld [vmem:[%s2983_s2 + $0x28] sm:$0xff] }
  0xf8   :  { %v377_v19 = vrot.slane %v376_v18, 2 }
  0xfa   :  { %v378_v20 = vadd.f32 %v377_v19, %v376_v18  ;;  %v1576_v18 = vld [vmem:[%s2983_s2 + $0xc0] sm:$0xff] }
  0xfb   :  { %v620_v19 = vld [vmem:[%s2983_s2 + $0x20] sm:$0xff] }
  0xfc   :  { %v379_v21 = vrot.slane %v378_v20, 1 }
  0xfe   :  { %v380_v22 = vadd.f32 %v379_v21, %v378_v20  ;;  %v1575_v20 = vld [vmem:[%s2983_s2 + $0xb8] sm:$0xff] }
  0xff   :  { %v619_v21 = vld [vmem:[%s2983_s2 + $0x18] sm:$0xff] }
 0x100   :  { %1939 = vmatmul.mubr.f32.vlgmr.msra.gmra.mxu1 %v380_v22  ;;  %v1574_v22 = vld [vmem:[%s2983_s2 + $0xb0] sm:$0xff] }
 0x101   :  { %1977 = vmatpush3.msra.mxu1 %v1583_v4 }
 0x102   :  { %1978 = vmatprep.subr.mxu1 %v1582_v6 }
 0x103   :  { %1979 = vmatpush3.msra.mxu1 %v1582_v6 }
 0x104   :  { %1980 = vmatprep.subr.mxu1 %v1581_v8 }
 0x105   :  { %1981 = vmatpush3.msra.mxu1 %v1581_v8 }
 0x106   :  { %1982 = vmatprep.subr.mxu1 %v1580_v10 }
 0x107   :  { %1983 = vmatpush3.msra.mxu1 %v1580_v10 }
 0x108   :  { %1984 = vmatprep.subr.mxu1 %v1579_v12 }
 0x109   :  { %1985 = vmatpush3.msra.mxu1 %v1579_v12 }
 0x1c0   :  { %v463_v26 = vpop.f32.mrf.mxu1 }
 0x1c1   :  { %v467_v27 = vmul.f32 0.001953125, %v463_v26  ;;  %v617_v26 = vld [vmem:[%s2983_s2 + $0x8] sm:$0xff] }
 0x1c2   :  { %v1940_v28 = vpop.f32.mrf.mxu1 }
 0x1c3   :  { %v471_v29 = vrot.slane %v467_v27, %v2586_v25  ;;  %v1572_v27 = vld [vmem:[%s2983_s2 + $0xa0] sm:$0xff] }
 0x1c4   :  { %v616_v28 = vld [vmem:[%s2983_s2] sm:$0xff] }
 0x1c5   :  { %v2589_v30 = vsub.f32 %v368_v7, %v471_v29  ;;  %v2591_v31 = vsub.f32 %v369_v9, %v471_v29  ;;  %v2593_v32 = vsub.f32 %v370_v13, %v471_v29  ;;  %v2595_v33 = vsub.f32 %v371_v14, %v471_v29  ;;  %v626_v7 = vld [vmem:[%s2983_s2 + $0x50] sm:$0xff]  ;;  %v625_v9 = vld [vmem:[%s2983_s2 + $0x48] sm:$0xff]  ;;  %v623_v13 = vld [vmem:[%s2983_s2 + $0x38] sm:$0xff] }
 0x1c6   :  { %v1578_v14 = vld [vmem:[%s2983_s2 + $0xd0] sm:$0xff]  ;;  %v1571_v29 = vld [vmem:[%s2983_s2 + $0x98] sm:$0xff] }
 0x1c7   :  { %v476_v34 = vmul.f32 %v2589_v30, %v2589_v30  ;;  %v477_v35 = vmul.f32 %v2591_v31, %v2591_v31  ;;  %v478_v53 = vmul.f32 %v2593_v32, %v2593_v32  ;;  %v479_v55 = vmul.f32 %v2595_v33, %v2595_v33  ;;  %1986 = vmatprep.subr.mxu1 %v1578_v14 }
 0x1c8   :  { %1987 = vmatpush3.msra.mxu1 %v1578_v14 }
 0x1c9   :  { %v480_v54 = vadd.f32 %v477_v35, %v476_v34  ;;  %1988 = vmatprep.subr.mxu1 %v1577_v16  ;;  %v1570_v34 = vld [vmem:[%s2983_s2 + $0x90] sm:$0xff]  ;;  %v1569_v35 = vld [vmem:[%s2983_s2 + $0x88] sm:$0xff] }
 0x1ca   :  { %1989 = vmatpush3.msra.mxu1 %v1577_v16 }
 0x1cb   :  { %v481_v56 = vadd.f32 %v480_v54, %v478_v53  ;;  %1990 = vmatprep.subr.mxu1 %v1576_v18  ;;  %v1568_v53 = vld [vmem:[%s2983_s2 + $0x80] sm:$0xff]  ;;  %v1599_v54 = vld [vmem:[%s2983_s2 + $0x178] sm:$0xff] }
 0x1cc   :  { %1991 = vmatpush3.msra.mxu1 %v1576_v18 }
 0x1cd   :  { %v482_v57 = vadd.f32 %v481_v56, %v479_v55  ;;  %1992 = vmatprep.subr.mxu1 %v1575_v20 }
 0x1ce   :  { %1993 = vmatpush3.msra.mxu1 %v1575_v20  ;;  %v1598_v20 = vld [vmem:[%s2983_s2 + $0x170] sm:$0xff] }
 0x1cf   :  { %v483_v58 = vrot.slane %v482_v57, 4  ;;  %1994 = vmatprep.subr.mxu1 %v1574_v22 }
 0x1d0   :  { %1995 = vmatpush3.msra.mxu1 %v1574_v22  ;;  %v1597_v22 = vld [vmem:[%s2983_s2 + $0x168] sm:$0xff] }
 0x1d1   :  { %v484_v59 = vadd.f32 %v483_v58, %v482_v57  ;;  %1996 = vmatprep.subr.mxu1 %v1573_v24 }
 0x1d2   :  { %1997 = vmatpush3.msra.mxu1 %v1573_v24  ;;  %v1596_v24 = vld [vmem:[%s2983_s2 + $0x160] sm:$0xff] }
 0x1d3   :  { %v485_v60 = vrot.slane %v484_v59, 2  ;;  %1998 = vmatprep.subr.mxu1 %v1572_v27 }
 0x1d4   :  { %1999 = vmatpush3.msra.mxu1 %v1572_v27  ;;  %v1595_v27 = vld [vmem:[%s2983_s2 + $0x158] sm:$0xff] }
 0x1d5   :  { %v486_v61 = vadd.f32 %v485_v60, %v484_v59  ;;  %2000 = vmatprep.subr.mxu1 %v1571_v29  ;;  %v560_v59 = vld [vmem:[%s2982_s4 + $0x1] sm:$0x1] }
 0x1d6   :  { %2001 = vmatpush3.msra.mxu1 %v1571_v29  ;;  %v1593_v29 = vld [vmem:[%s2983_s2 + $0x148] sm:$0xff] }
 0x1d7   :  { %v487_v62 = vrot.slane %v486_v61, 1  ;;  %2002 = vmatprep.subr.mxu1 %v1570_v34 }
 0x1d8   :  { %2003 = vmatpush3.msra.mxu1 %v1570_v34  ;;  %v1592_v34 = vld [vmem:[%s2983_s2 + $0x140] sm:$0xff] }
 0x1d9   :  { %v488_v63 = vadd.f32 %v487_v62, %v486_v61  ;;  %2004 = vmatprep.subr.mxu1 %v1569_v35 }
 0x1da   :  { %2005 = vmatpush3.msra.mxu1 %v1569_v35  ;;  %v1591_v35 = vld [vmem:[%s2983_s2 + $0x138] sm:$0xff] }
 0x1db   :  { %1974 = vmatmul.mubr.f32.vlgmr.msra.gmra.mxu0 %v488_v63  ;;  %2006 = vmatprep.subr.mxu1 %v1568_v53  ;;  %v1567_v63 = vld [vmem:[%s2982_s4 + $0x2] ss:$0 sm:$0xff] }
 0x1dc   :  { %2015 = vmatpush3.msra.mxu0 %v631_v0  ;;  %2007 = vmatpush3.msra.mxu1 %v1568_v53  ;;  %v1590_v53 = vld [vmem:[%s2983_s2 + $0x130] sm:$0xff] }
 0x1dd   :  { %2016 = vmatprep.subr.mxu0 %v630_v1  ;;  %2052 = vmatprep.subr.mxu1 %v1599_v54 }
 0x1de   :  { %2017 = vmatpush3.msra.mxu0 %v630_v1 }
 0x1df   :  { %2018 = vmatprep.subr.mxu0 %v629_v2 }
 0x1e0   :  { %2019 = vmatpush3.msra.mxu0 %v629_v2 }
 0x1e1   :  { %2020 = vmatprep.subr.mxu0 %v628_v3 }
 0x1e2   :  { %2021 = vmatpush3.msra.mxu0 %v628_v3 }
 0x1e3   :  { %2022 = vmatprep.subr.mxu0 %v627_v5 }
 0x1e4   :  { %2023 = vmatpush3.msra.mxu0 %v627_v5 }
 0x1e5   :  { %2024 = vmatprep.subr.mxu0 %v626_v7 }
 0x1e6   :  { %2025 = vmatpush3.msra.mxu0 %v626_v7 }
 0x1e7   :  { %2026 = vmatprep.subr.mxu0 %v625_v9 }
 0x1e8   :  { %2027 = vmatpush3.msra.mxu0 %v625_v9 }
 0x1e9   :  { %2028 = vmatprep.subr.mxu0 %v624_v11 }
 0x1ea   :  { %2029 = vmatpush3.msra.mxu0 %v624_v11 }
 0x1eb   :  { %2030 = vmatprep.subr.mxu0 %v623_v13 }
 0x1ec   :  { %2031 = vmatpush3.msra.mxu0 %v623_v13 }
 0x1ed   :  { %2032 = vmatprep.subr.mxu0 %v622_v15 }
 0x1ee   :  { %2033 = vmatpush3.msra.mxu0 %v622_v15 }
 0x1ef   :  { %2034 = vmatprep.subr.mxu0 %v621_v17 }
 0x1f0   :  { %2035 = vmatpush3.msra.mxu0 %v621_v17 }
 0x1f1   :  { %2036 = vmatprep.subr.mxu0 %v620_v19 }
 0x1f2   :  { %2037 = vmatpush3.msra.mxu0 %v620_v19 }
 0x1f3   :  { %2038 = vmatprep.subr.mxu0 %v619_v21 }
 0x1f4   :  { %2039 = vmatpush3.msra.mxu0 %v619_v21 }
 0x1f5   :  { %2040 = vmatprep.subr.mxu0 %v618_v23 }
 0x1f6   :  { %2041 = vmatpush3.msra.mxu0 %v618_v23 }
 0x1f7   :  { %2042 = vmatprep.subr.mxu0 %v617_v26 }
 0x1f8   :  { %2043 = vmatpush3.msra.mxu0 %v617_v26 }
 0x1f9   :  { %2044 = vmatprep.subr.mxu0 %v616_v28 }
 0x1fa   :  { %2045 = vmatpush3.msra.mxu0 %v616_v28  ;;  %v1594_v28 = vld [vmem:[%s2983_s2 + $0x150] sm:$0xff] }
 0x1fb   :  { %2090 = vmatprep.subr.mxu0 %v2268_v36 }
 0x29b   :  { %v555_v55 = vpop.f32.mrf.mxu0 }
 0x29c   :  { %v559_v56 = vmul.f32 0.001953125, %v555_v55  ;;  %v1588_v55 = vld [vmem:[%s2983_s2 + $0x120] sm:$0xff] }
 0x29d   :  { %v1975_v57 = vpop.f32.mrf.mxu0 }
 0x29e   :  { %v561_v58 = vadd.f32 1e-05, %v559_v56  ;;  %v1587_v56 = vld [vmem:[%s2983_s2 + $0x118] sm:$0xff]  ;;  %v1586_v57 = vld [vmem:[%s2983_s2 + $0x110] sm:$0xff] }
 0x2a0   :  { %2260 = vrsqrt.f32 %v561_v58  ;;  %v1585_v58 = vld [vmem:[%s2983_s2 + $0x108] sm:$0xff] }
 0x2ad   :  { %v2261_v60 = vpop.eup %2260 }
 0x2ae   :  { %v563_v61 = vmul.f32 %v2261_v60, %v560_v59  ;;  %v1584_v59 = vld [vmem:[%s2983_s2 + $0x100] sm:$0xff] }
 0x2b0   :  { %v567_v62 = vrot.slane %v563_v61, %v2586_v25 }
 0x2b2   :  { %v568_v0 = vmul.f32 %v567_v62, %v2589_v30  ;;  %v569_v1 = vmul.f32 %v567_v62, %v2591_v31  ;;  %v570_v2 = vmul.f32 %v567_v62, %v2593_v32  ;;  %v571_v3 = vmul.f32 %v567_v62, %v2595_v33 }
 0x2b4   :  { %v577_v4 = vadd.f32 %v1567_v63, %v568_v0  ;;  %v578_v5 = vadd.f32 %v1567_v63, %v569_v1  ;;  %v579_v6 = vadd.f32 %v1567_v63, %v570_v2  ;;  %v580_v7 = vadd.f32 %v1567_v63, %v571_v3 }
 0x2b6   :  { %v581_v8 = vmax.f32 %v577_v4, 0.0  ;;  %v582_v9 = vmax.f32 %v578_v5, 0.0  ;;  %v583_v10 = vmax.f32 %v579_v6, 0.0  ;;  %v584_v11 = vmax.f32 %v580_v7, 0.0 }
 0x2b8   :  { %v590_v12 = vrot.slane %v581_v8, 7  ;;  %v591_v13 = vrot.slane %v582_v9, 7  ;;  %v593_v14 = vrot.slane %v583_v10, 7  ;;  %v594_v15 = vrot.slane %v584_v11, 7 }
 0x2ba   :  { %v592_v30 = vsel %vm589_vm2, %v590_v12, %v591_v13  ;;  %v595_v16 = vsel %vm589_vm2, %v593_v14, %v594_v15  ;;  %v602_v31 = vsel %vm589_vm2, 0.0, %v590_v12  ;;  %v603_v17 = vsel %vm589_vm2, 0.0, %v593_v14  ;;  %2265 = vmatprep.mubr.msk.f32.mxu0 %vm2264_vm3, %v590_v12 }
 0x2bb   :  { %v604_v32 = vsel %vm589_vm2, %v591_v13, 0.0  ;;  %v605_v18 = vsel %vm589_vm2, %v594_v15, 0.0  ;;  %606 = vst [vmem:[#allocation2] sm:$0xff] %v602_v31  ;;  %607 = vst [vmem:[#allocation2 + $0x8] sm:$0xff] %v592_v30  ;;  %2047 = vmatmul.mubr.f32.vlgmr.msra.gmra.mxu0 %v592_v30  ;;  %v1170_v30 = vld [vmem:[%s2985_s6 + $0x78] sm:$0xff] }
 0x2bc   :  { %609 = vst [vmem:[#allocation2 + $0x18] sm:$0xff] %v603_v17  ;;  %610 = vst [vmem:[#allocation2 + $0x20] sm:$0xff] %v595_v16  ;;  %2267 = vmatprep.mubr.msk.f32.mxu0 %vm2264_vm3, %v593_v14  ;;  %2091 = vmatpush3.msra.mxu0 %v2440_v37 }
 0x2bd   :  { %608 = vst [vmem:[#allocation2 + $0x10] sm:$0x3] %v604_v32  ;;  %611 = vst [vmem:[#allocation2 + $0x28] sm:$0x3] %v605_v18  ;;  %2092 = vmatprep.subr.mxu0 %v2268_v36 }
 0x2be   :  { %2093 = vmatpush3.msra.mxu0 %v2445_v38 }
 0x2bf   :  { %2050 = vmatmul.mubr.f32.gmra.mxu0 %v595_v16  ;;  %2094 = vmatprep.subr.mxu0 %v2268_v36  ;;  %v1617_v16 = vld [vmem:[%s2985_s6 + $0xf8] sm:$0xff] }
 0x2c0   :  { %2095 = vmatpush3.msra.mxu0 %v2458_v39  ;;  %2122 = vmatprep.mubr.msk.f32.mxu0 %vm2269_vm1, %v2268_v36 }
 0x2c1   :  { %2096 = vmatprep.subr.mxu0 %v2268_v36 }
 0x2c2   :  { %v632_v33 = vld [vmem:[#allocation2 + $0x1] sm:$0xff]  ;;  %2097 = vmatpush3.msra.mxu0 %v2466_v40 }
 0x2c3   :  { %2008 = vmatprep.mubr.f32.mxu1 %v632_v33  ;;  %v634_v21 = vld [vmem:[#allocation2 + $0x19] sm:$0xff]  ;;  %2098 = vmatprep.subr.mxu0 %v2268_v36  ;;  %v823_v26 = vld [vmem:[#allocation2 + $0x2] sm:$0xff] }
 0x2c4   :  { %v633_v19 = vld [vmem:[#allocation2 + $0x9] sm:$0xff]  ;;  %2099 = vmatpush3.msra.mxu0 %v2475_v41  ;;  %v635_v23 = vld [vmem:[#allocation2 + $0x21] sm:$0xff] }
 0x2c5   :  { %2009 = vmatmul.mubr.f32.vlgmr.msra.gmra.mxu1 %v633_v19  ;;  %2100 = vmatprep.subr.mxu0 %v2268_v36  ;;  %v824_v60 = vld [vmem:[#allocation2 + $0xa] sm:$0xff]  ;;  %v825_v61 = vld [vmem:[#allocation2 + $0x1a] sm:$0xff]  ;;  %v826_v62 = vld [vmem:[#allocation2 + $0x22] sm:$0xff] }
 0x2c6   :  { %2053 = vmatpush3.msra.mxu1 %v1599_v54  ;;  %2011 = vmatprep.mubr.f32.mxu1 %v634_v21  ;;  %v1589_v54 = vld [vmem:[%s2983_s2 + $0x128] sm:$0xff] }
 0x2c7   :  { %2054 = vmatprep.subr.mxu1 %v1598_v20  ;;  %2101 = vmatpush3.msra.mxu0 %v2484_v42 }
 0x2c8   :  { %2055 = vmatpush3.msra.mxu1 %v1598_v20  ;;  %2102 = vmatprep.subr.mxu0 %v2268_v36 }
 0x2c9   :  { %2056 = vmatprep.subr.mxu1 %v1597_v22  ;;  %2012 = vmatmul.mubr.f32.gmra.mxu1 %v635_v23 }
 0x2ca   :  { %2057 = vmatpush3.msra.mxu1 %v1597_v22  ;;  %2084 = vmatprep.mubr.f32.mxu1 %v823_v26 }
 0x2cb   :  { %2058 = vmatprep.subr.mxu1 %v1596_v24  ;;  %2103 = vmatpush3.msra.mxu0 %v2493_v43 }
 0x2cc   :  { %2059 = vmatpush3.msra.mxu1 %v1596_v24  ;;  %2104 = vmatprep.subr.mxu0 %v2268_v36 }
 0x2cd   :  { %2060 = vmatprep.subr.mxu1 %v1595_v27  ;;  %2105 = vmatpush3.msra.mxu0 %v2502_v44 }
 0x2ce   :  { %2061 = vmatpush3.msra.mxu1 %v1595_v27  ;;  %2106 = vmatprep.subr.mxu0 %v2268_v36 }
 0x2cf   :  { %2062 = vmatprep.subr.mxu1 %v1594_v28  ;;  %2107 = vmatpush3.msra.mxu0 %v2511_v45 }
 0x2d0   :  { %2063 = vmatpush3.msra.mxu1 %v1594_v28  ;;  %2108 = vmatprep.subr.mxu0 %v2268_v36 }
 0x2d1   :  { %2064 = vmatprep.subr.mxu1 %v1593_v29  ;;  %2109 = vmatpush3.msra.mxu0 %v2520_v46 }
 0x2d2   :  { %2065 = vmatpush3.msra.mxu1 %v1593_v29  ;;  %2110 = vmatprep.subr.mxu0 %v2268_v36 }
 0x2d3   :  { %2066 = vmatprep.subr.mxu1 %v1592_v34  ;;  %2111 = vmatpush3.msra.mxu0 %v2529_v47 }
 0x2d4   :  { %2067 = vmatpush3.msra.mxu1 %v1592_v34  ;;  %2112 = vmatprep.subr.mxu0 %v2268_v36 }
 0x2d5   :  { %2068 = vmatprep.subr.mxu1 %v1591_v35  ;;  %2113 = vmatpush3.msra.mxu0 %v2538_v48 }
 0x2d6   :  { %2069 = vmatpush3.msra.mxu1 %v1591_v35  ;;  %2114 = vmatprep.subr.mxu0 %v2268_v36 }
 0x2d7   :  { %2070 = vmatprep.subr.mxu1 %v1590_v53  ;;  %2115 = vmatpush3.msra.mxu0 %v2547_v49 }
 0x2d8   :  { %2071 = vmatpush3.msra.mxu1 %v1590_v53  ;;  %2116 = vmatprep.subr.mxu0 %v2268_v36 }
 0x2d9   :  { %2072 = vmatprep.subr.mxu1 %v1589_v54  ;;  %2117 = vmatpush3.msra.mxu0 %v2556_v50 }
 0x2da   :  { %2073 = vmatpush3.msra.mxu1 %v1589_v54  ;;  %2118 = vmatprep.subr.mxu0 %v2268_v36 }
 0x2db   :  { %2074 = vmatprep.subr.mxu1 %v1588_v55  ;;  %2119 = vmatpush3.msra.mxu0 %v2565_v51 }
 0x2dc   :  { %2075 = vmatpush3.msra.mxu1 %v1588_v55  ;;  %2120 = vmatprep.subr.mxu0 %v2268_v36 }
 0x2dd   :  { %2076 = vmatprep.subr.mxu1 %v1587_v56  ;;  %2121 = vmatpush3.msra.mxu0 %v2570_v52 }
 0x2de   :  { %2077 = vmatpush3.msra.mxu1 %v1587_v56  ;;  %2160 = vmatprep.subr.mxu0 %v1170_v30 }
 0x2df   :  { %2078 = vmatprep.subr.mxu1 %v1586_v57 }
 0x2e0   :  { %2079 = vmatpush3.msra.mxu1 %v1586_v57  ;;  %v1169_v57 = vld [vmem:[%s2985_s6 + $0x70] sm:$0xff] }
 0x2e1   :  { %2080 = vmatprep.subr.mxu1 %v1585_v58 }
 0x2e2   :  { %2081 = vmatpush3.msra.mxu1 %v1585_v58  ;;  %v1616_v58 = vld [vmem:[%s2985_s6 + $0xf0] sm:$0xff] }
 0x2e3   :  { %2082 = vmatprep.subr.mxu1 %v1584_v59 }
 0x2e4   :  { %2083 = vmatpush3.msra.mxu1 %v1584_v59  ;;  %v1168_v59 = vld [vmem:[%s2985_s6 + $0x68] sm:$0xff] }
 0x2e5   :  { %2085 = vmatmul.mubr.f32.vlgmr.msra.gmra.mxu1 %v824_v60  ;;  %2125 = vmatprep.subr.mxu1 %v2268_v36  ;;  %v1615_v60 = vld [vmem:[%s2985_s6 + $0xe8] sm:$0xff] }
 0x2e6   :  { %2087 = vmatprep.mubr.f32.mxu1 %v825_v61  ;;  %2126 = vmatpush3.msra.mxu1 %v2440_v37  ;;  %v1167_v61 = vld [vmem:[%s2985_s6 + $0x60] sm:$0xff] }
 0x2e7   :  { %2127 = vmatprep.subr.mxu1 %v2268_v36 }
 0x2e8   :  { %2128 = vmatpush3.msra.mxu1 %v2445_v38 }
 0x2e9   :  { %2088 = vmatmul.mubr.f32.gmra.mxu1 %v826_v62  ;;  %2129 = vmatprep.subr.mxu1 %v2268_v36  ;;  %v1614_v62 = vld [vmem:[%s2985_s6 + $0xe0] sm:$0xff] }
 0x2ea   :  { %2130 = vmatpush3.msra.mxu1 %v2458_v39  ;;  %2157 = vmatprep.mubr.msk.f32.mxu1 %vm2269_vm1, %v2268_v36 }
 0x2eb   :  { %2131 = vmatprep.subr.mxu1 %v2268_v36 }
 0x2ec   :  { %2132 = vmatpush3.msra.mxu1 %v2466_v40 }
 0x2ed   :  { %2133 = vmatprep.subr.mxu1 %v2268_v36 }
 0x2ee   :  { %2134 = vmatpush3.msra.mxu1 %v2475_v41 }
 0x2ef   :  { %2135 = vmatprep.subr.mxu1 %v2268_v36 }
 0x2f0   :  { %2136 = vmatpush3.msra.mxu1 %v2484_v42 }
 0x2f1   :  { %2137 = vmatprep.subr.mxu1 %v2268_v36 }
 0x2f2   :  { %2138 = vmatpush3.msra.mxu1 %v2493_v43 }
 0x2f3   :  { %2139 = vmatprep.subr.mxu1 %v2268_v36 }
 0x2f4   :  { %2140 = vmatpush3.msra.mxu1 %v2502_v44 }
 0x2f5   :  { %2141 = vmatprep.subr.mxu1 %v2268_v36 }
 0x2f6   :  { %2142 = vmatpush3.msra.mxu1 %v2511_v45 }
 0x2f7   :  { %2143 = vmatprep.subr.mxu1 %v2268_v36 }
 0x2f8   :  { %2144 = vmatpush3.msra.mxu1 %v2520_v46 }
 0x2f9   :  { %2145 = vmatprep.subr.mxu1 %v2268_v36 }
 0x2fa   :  { %2146 = vmatpush3.msra.mxu1 %v2529_v47 }
 0x2fb   :  { %2147 = vmatprep.subr.mxu1 %v2268_v36 }
 0x2fc   :  { %2148 = vmatpush3.msra.mxu1 %v2538_v48 }
 0x2fd   :  { %2149 = vmatprep.subr.mxu1 %v2268_v36 }
 0x2fe   :  { %2150 = vmatpush3.msra.mxu1 %v2547_v49 }
 0x2ff   :  { %2151 = vmatprep.subr.mxu1 %v2268_v36 }
 0x300   :  { %2152 = vmatpush3.msra.mxu1 %v2556_v50 }
 0x301   :  { %2153 = vmatprep.subr.mxu1 %v2268_v36 }
 0x302   :  { %2154 = vmatpush3.msra.mxu1 %v2565_v51 }
 0x303   :  { %2155 = vmatprep.subr.mxu1 %v2268_v36  ;;  %v1600_v36 = vld [vmem:[%s2984_s5] ss:$0 sm:$0xff] }
 0x304   :  { %2156 = vmatpush3.msra.mxu1 %v2570_v52 }
 0x305   :  { %2198 = vmatprep.subr.mxu1 %v1617_v16 }
 0x37b   :  { %v2048_v39 = vpop.f32.mrf.mxu0 }
 0x37d   :  { %v804_v41 = vpop.f32.mrf.mxu0 }
 0x37f   :  { %v2051_v43 = vpop.f32.mrf.mxu0 }
 0x381   :  { %v814_v50 = vpop.f32.mrf.mxu0 }
 0x385   :  { %v2010_v37 = vpop.f32.mrf.mxu1 }
 0x386   :  { %v810_v45 = vadd.f32 %v2048_v39, %v2010_v37  ;;  %v1166_v37 = vld [vmem:[%s2985_s6 + $0x58] sm:$0xff]  ;;  %v1165_v39 = vld [vmem:[%s2985_s6 + $0x50] sm:$0xff] }
 0x387   :  { %v719_v38 = vpop.f32.mrf.mxu1 }
 0x388   :  { %v805_v46 = vadd.f32 %v804_v41, %v719_v38  ;;  %v1613_v38 = vld [vmem:[%s2985_s6 + $0xd8] sm:$0xff]  ;;  %v1164_v41 = vld [vmem:[%s2985_s6 + $0x48] sm:$0xff] }
 0x389   :  { %v2013_v40 = vpop.f32.mrf.mxu1 }
 0x38a   :  { %v820_v52 = vadd.f32 %v2051_v43, %v2013_v40  ;;  %v1612_v40 = vld [vmem:[%s2985_s6 + $0xd0] sm:$0xff]  ;;  %v1163_v43 = vld [vmem:[%s2985_s6 + $0x40] sm:$0xff] }
 0x38b   :  { %v729_v42 = vpop.f32.mrf.mxu1 }
 0x38c   :  { %v815_v63 = vadd.f32 %v814_v50, %v729_v42  ;;  %v1611_v42 = vld [vmem:[%s2985_s6 + $0xc8] sm:$0xff] }
 0x38d   :  { %v1607_v50 = vld [vmem:[%s2985_s6 + $0xa8] sm:$0xff] }
 0x3a5   :  { %v2086_v44 = vpop.f32.mrf.mxu1 }
 0x3a6   :  { %v930_v48 = vadd.f32 %v2086_v44, %v810_v45  ;;  %v1610_v44 = vld [vmem:[%s2985_s6 + $0xc0] sm:$0xff]  ;;  %v1162_v45 = vld [vmem:[%s2985_s6 + $0x38] sm:$0xff] }
 0x3a7   :  { %v910_v47 = vpop.f32.mrf.mxu1 }
 0x3a8   :  { %v929_v49 = vadd.f32 %v910_v47, %v805_v46  ;;  %v939_v2 = vadd.f32 %v1600_v36, %v930_v48  ;;  %v1609_v46 = vld [vmem:[%s2985_s6 + $0xb8] sm:$0xff]  ;;  %v1161_v47 = vld [vmem:[%s2985_s6 + $0x30] sm:$0xff] }
 0x3a9   :  { %v2089_v51 = vpop.f32.mrf.mxu1  ;;  %v1608_v48 = vld [vmem:[%s2985_s6 + $0xb0] sm:$0xff] }
 0x3aa   :  { %v938_v0 = vadd.f32 %v1600_v36, %v929_v49  ;;  %v932_v3 = vadd.f32 %v2089_v51, %v820_v52  ;;  %v1160_v49 = vld [vmem:[%s2985_s6 + $0x28] sm:$0xff]  ;;  %v1606_v51 = vld [vmem:[%s2985_s6 + $0xa0] sm:$0xff]  ;;  %v1158_v52 = vld [vmem:[%s2985_s6 + $0x18] sm:$0xff] }
 0x3ab   :  { %v920_v1 = vpop.f32.mrf.mxu1 }
 0x3ac   :  { %v931_v4 = vadd.f32 %v920_v1, %v815_v63  ;;  %v942_v5 = vadd.f32 %v939_v2, %v938_v0  ;;  %v941_v7 = vadd.f32 %v1600_v36, %v932_v3  ;;  %v1605_v63 = vld [vmem:[%s2985_s6 + $0x98] sm:$0xff]  ;;  %v1604_v1 = vld [vmem:[%s2985_s6 + $0x90] sm:$0xff]  ;;  %v1603_v3 = vld [vmem:[%s2985_s6 + $0x88] sm:$0xff] }
 0x3ae   :  { %v940_v6 = vadd.f32 %v1600_v36, %v931_v4  ;;  %v1159_v36 = vld [vmem:[%s2985_s6 + $0x20] sm:$0xff] }
 0x3af   :  { %v1155_v4 = vld [vmem:[%s2985_s6] sm:$0xff] }
 0x3b0   :  { %v943_v8 = vadd.f32 %v942_v5, %v940_v6  ;;  %v1602_v5 = vld [vmem:[%s2985_s6 + $0x80] sm:$0xff] }
 0x3b2   :  { %v944_v9 = vadd.f32 %v943_v8, %v941_v7 }
 0x3b4   :  { %v945_v10 = vrot.slane %v944_v9, 4 }
 0x3b6   :  { %v946_v11 = vadd.f32 %v945_v10, %v944_v9  ;;  %v1130_v10 = vld [vmem:[%s2984_s5 + $0x1] sm:$0x1] }
 0x3b8   :  { %v947_v12 = vrot.slane %v946_v11, 2 }
 0x3ba   :  { %v948_v13 = vadd.f32 %v947_v12, %v946_v11 }
 0x3bc   :  { %v949_v14 = vrot.slane %v948_v13, 1 }
 0x3be   :  { %v950_v15 = vadd.f32 %v949_v14, %v948_v13  ;;  %v1601_v14 = vld [vmem:[%s2984_s5 + $0x2] ss:$0 sm:$0xff] }
 0x3c0   :  { %2123 = vmatmul.mubr.f32.vlgmr.msra.gmra.mxu0 %v950_v15 }
 0x3c1   :  { %2161 = vmatpush3.msra.mxu0 %v1170_v30 }
 0x3c2   :  { %2162 = vmatprep.subr.mxu0 %v1169_v57 }
 0x3c3   :  { %2163 = vmatpush3.msra.mxu0 %v1169_v57  ;;  %v1363_v57 = vld [vmem:[%s2986_s7 + $0x8] sm:$0xff] }
 0x3c4   :  { %2164 = vmatprep.subr.mxu0 %v1168_v59 }
 0x3c5   :  { %2165 = vmatpush3.msra.mxu0 %v1168_v59  ;;  %v1621_v59 = vld [vmem:[%s2986_s7 + $0x18] sm:$0xff] }
 0x3c6   :  { %2166 = vmatprep.subr.mxu0 %v1167_v61 }
 0x3c7   :  { %2167 = vmatpush3.msra.mxu0 %v1167_v61 }
 0x3c8   :  { %2168 = vmatprep.subr.mxu0 %v1166_v37 }
 0x3c9   :  { %2169 = vmatpush3.msra.mxu0 %v1166_v37 }
 0x3ca   :  { %2170 = vmatprep.subr.mxu0 %v1165_v39 }
 0x3cb   :  { %2171 = vmatpush3.msra.mxu0 %v1165_v39 }
 0x3cc   :  { %2172 = vmatprep.subr.mxu0 %v1164_v41 }
 0x3cd   :  { %2173 = vmatpush3.msra.mxu0 %v1164_v41 }
 0x3ce   :  { %2174 = vmatprep.subr.mxu0 %v1163_v43 }
 0x3cf   :  { %2175 = vmatpush3.msra.mxu0 %v1163_v43 }
 0x3d0   :  { %2176 = vmatprep.subr.mxu0 %v1162_v45 }
 0x3d1   :  { %2177 = vmatpush3.msra.mxu0 %v1162_v45 }
 0x3d2   :  { %2178 = vmatprep.subr.mxu0 %v1161_v47 }
 0x3d3   :  { %2179 = vmatpush3.msra.mxu0 %v1161_v47 }
 0x3d4   :  { %2180 = vmatprep.subr.mxu0 %v1160_v49 }
 0x3d5   :  { %2181 = vmatpush3.msra.mxu0 %v1160_v49 }
 0x3d6   :  { %2182 = vmatprep.subr.mxu0 %v1159_v36 }
 0x3d7   :  { %2183 = vmatpush3.msra.mxu0 %v1159_v36 }
 0x3d8   :  { %2184 = vmatprep.subr.mxu0 %v1158_v52 }
 0x3d9   :  { %2185 = vmatpush3.msra.mxu0 %v1158_v52 }
 0x480   :  { %v1033_v31 = vpop.f32.mrf.mxu0 }
 0x481   :  { %v1037_v17 = vmul.f32 0.001953125, %v1033_v31 }
 0x482   :  { %v2124_v32 = vpop.f32.mrf.mxu0 }
 0x483   :  { %v1041_v18 = vrot.slane %v1037_v17, %v2586_v25 }
 0x485   :  { %v2838_v33 = vsub.f32 %v938_v0, %v1041_v18  ;;  %v2840_v19 = vsub.f32 %v939_v2, %v1041_v18  ;;  %v2842_v20 = vsub.f32 %v940_v6, %v1041_v18  ;;  %v2844_v21 = vsub.f32 %v941_v7, %v1041_v18  ;;  %v1157_v0 = vld [vmem:[%s2985_s6 + $0x10] sm:$0xff]  ;;  %v1156_v2 = vld [vmem:[%s2985_s6 + $0x8] sm:$0xff] }
 0x486   :  { %2186 = vmatprep.subr.mxu0 %v1157_v0 }
 0x487   :  { %v1046_v22 = vmul.f32 %v2838_v33, %v2838_v33  ;;  %v1047_v23 = vmul.f32 %v2840_v19, %v2840_v19  ;;  %v1048_v24 = vmul.f32 %v2842_v20, %v2842_v20  ;;  %v1049_v27 = vmul.f32 %v2844_v21, %v2844_v21  ;;  %2187 = vmatpush3.msra.mxu0 %v1157_v0 }
 0x488   :  { %2188 = vmatprep.subr.mxu0 %v1156_v2 }
 0x489   :  { %v1050_v26 = vadd.f32 %v1047_v23, %v1046_v22  ;;  %2189 = vmatpush3.msra.mxu0 %v1156_v2 }
 0x48a   :  { %2190 = vmatprep.subr.mxu0 %v1155_v4 }
 0x48b   :  { %v1051_v28 = vadd.f32 %v1050_v26, %v1048_v24  ;;  %2191 = vmatpush3.msra.mxu0 %v1155_v4 }
 0x48d   :  { %v1052_v29 = vadd.f32 %v1051_v28, %v1049_v27 }
 0x48f   :  { %v1053_v34 = vrot.slane %v1052_v29, 4 }
 0x491   :  { %v1054_v35 = vadd.f32 %v1053_v34, %v1052_v29 }
 0x493   :  { %v1055_v53 = vrot.slane %v1054_v35, 2 }
 0x495   :  { %v1056_v54 = vadd.f32 %v1055_v53, %v1054_v35 }
 0x497   :  { %v1057_v55 = vrot.slane %v1056_v54, 1 }
 0x499   :  { %v1058_v56 = vadd.f32 %v1057_v55, %v1056_v54 }
 0x49b   :  { %2158 = vmatmul.mubr.f32.vlgmr.msra.gmra.mxu1 %v1058_v56 }
 0x49c   :  { %2199 = vmatpush3.msra.mxu1 %v1617_v16 }
 0x49d   :  { %2200 = vmatprep.subr.mxu1 %v1616_v58 }
 0x49e   :  { %2201 = vmatpush3.msra.mxu1 %v1616_v58  ;;  %v1620_v58 = vld [vmem:[%s2986_s7 + $0x10] sm:$0xff] }
 0x49f   :  { %2202 = vmatprep.subr.mxu1 %v1615_v60 }
 0x4a0   :  { %2203 = vmatpush3.msra.mxu1 %v1615_v60 }
 0x4a1   :  { %2204 = vmatprep.subr.mxu1 %v1614_v62 }
 0x4a2   :  { %2205 = vmatpush3.msra.mxu1 %v1614_v62 }
 0x4a3   :  { %2206 = vmatprep.subr.mxu1 %v1613_v38 }
 0x4a4   :  { %2207 = vmatpush3.msra.mxu1 %v1613_v38 }
 0x4a5   :  { %2208 = vmatprep.subr.mxu1 %v1612_v40 }
 0x4a6   :  { %2209 = vmatpush3.msra.mxu1 %v1612_v40 }
 0x4a7   :  { %2210 = vmatprep.subr.mxu1 %v1611_v42 }
 0x4a8   :  { %2211 = vmatpush3.msra.mxu1 %v1611_v42 }
 0x4a9   :  { %2212 = vmatprep.subr.mxu1 %v1610_v44 }
 0x4aa   :  { %2213 = vmatpush3.msra.mxu1 %v1610_v44 }
 0x4ab   :  { %2214 = vmatprep.subr.mxu1 %v1609_v46 }
 0x4ac   :  { %2215 = vmatpush3.msra.mxu1 %v1609_v46 }
 0x4ad   :  { %2216 = vmatprep.subr.mxu1 %v1608_v48 }
 0x4ae   :  { %2217 = vmatpush3.msra.mxu1 %v1608_v48 }
 0x4af   :  { %2218 = vmatprep.subr.mxu1 %v1607_v50 }
 0x4b0   :  { %2219 = vmatpush3.msra.mxu1 %v1607_v50 }
 0x4b1   :  { %2220 = vmatprep.subr.mxu1 %v1606_v51 }
 0x4b2   :  { %2221 = vmatpush3.msra.mxu1 %v1606_v51 }
 0x4b3   :  { %2222 = vmatprep.subr.mxu1 %v1605_v63 }
 0x4b4   :  { %2223 = vmatpush3.msra.mxu1 %v1605_v63 }
 0x4b5   :  { %2224 = vmatprep.subr.mxu1 %v1604_v1 }
 0x4b6   :  { %2225 = vmatpush3.msra.mxu1 %v1604_v1 }
 0x4b7   :  { %2226 = vmatprep.subr.mxu1 %v1603_v3 }
 0x4b8   :  { %2227 = vmatpush3.msra.mxu1 %v1603_v3 }
 0x4b9   :  { %2228 = vmatprep.subr.mxu1 %v1602_v5 }
 0x4ba   :  { %2229 = vmatpush3.msra.mxu1 %v1602_v5 }
 0x55b   :  { %v1125_v6 = vpop.f32.mrf.mxu1 }
 0x55c   :  { %v1129_v7 = vmul.f32 0.001953125, %v1125_v6 }
 0x55d   :  { %v2159_v8 = vpop.f32.mrf.mxu1 }
 0x55e   :  { %v1131_v9 = vadd.f32 1e-05, %v1129_v7 }
 0x560   :  { %2262 = vrsqrt.f32 %v1131_v9 }
 0x56d   :  { %v2263_v11 = vpop.eup %2262 }
 0x56e   :  { %v1133_v12 = vmul.f32 %v2263_v11, %v1130_v10 }
 0x570   :  { %v1137_v13 = vrot.slane %v1133_v12, %v2586_v25 }
 0x572   :  { %v1138_v15 = vmul.f32 %v1137_v13, %v2838_v33  ;;  %v1139_v30 = vmul.f32 %v1137_v13, %v2840_v19  ;;  %v1140_v16 = vmul.f32 %v1137_v13, %v2842_v20  ;;  %v1141_v31 = vmul.f32 %v1137_v13, %v2844_v21  ;;  %v1362_v19 = vld [vmem:[%s2986_s7] sm:$0xff] }
 0x574   :  { %v1147_v17 = vadd.f32 %v1601_v14, %v1138_v15  ;;  %v1148_v32 = vadd.f32 %v1601_v14, %v1139_v30  ;;  %v1149_v18 = vadd.f32 %v1601_v14, %v1140_v16  ;;  %v1150_v24 = vadd.f32 %v1601_v14, %v1141_v31 }
 0x576   :  { %v1151_v22 = vmax.f32 %v1147_v17, 0.0  ;;  %v1152_v23 = vmax.f32 %v1148_v32, 0.0  ;;  %v1153_v25 = vmax.f32 %v1149_v18, 0.0  ;;  %v1154_v33 = vmax.f32 %v1150_v24, 0.0 }
 0x578   :  { %2192 = vmatprep.mubr.f32.mxu0 %v1151_v22  ;;  %2230 = vmatprep.mubr.f32.mxu1 %v1151_v22 }
 0x579   :  { %2193 = vmatmul.mubr.f32.vlgmr.msra.gmra.mxu0 %v1152_v23  ;;  %2231 = vmatmul.mubr.f32.vlgmr.msra.gmra.mxu1 %v1152_v23 }
 0x57a   :  { %2195 = vmatprep.mubr.f32.mxu0 %v1153_v25  ;;  %2233 = vmatprep.mubr.f32.mxu1 %v1153_v25 }
 0x57d   :  { %2196 = vmatmul.mubr.f32.gmra.mxu0 %v1154_v33  ;;  %2234 = vmatmul.mubr.f32.gmra.mxu1 %v1154_v33 }
 0x57e   :  { %2244 = vmatprep.mubr.msk.f32.mxu0 %vm1364_vm4, %v1362_v19 }
 0x639   :  { %v2194_v20 = vpop.f32.mrf.mxu0  ;;  %v2232_v21 = vpop.f32.mrf.mxu1 }
 0x63a   :  { %v1359_v55 = vmax.f32 %v2194_v20, %v2232_v21 }
 0x63b   :  { %v1237_v26 = vpop.f32.mrf.mxu0  ;;  %v1339_v27 = vpop.f32.mrf.mxu1 }
 0x63c   :  { %v1358_v56 = vmax.f32 %v1237_v26, %v1339_v27 }
 0x63d   :  { %v2197_v28 = vpop.f32.mrf.mxu0  ;;  %v2235_v29 = vpop.f32.mrf.mxu1 }
 0x63e   :  { %v1361_v34 = vmax.f32 %v2197_v28, %v2235_v29 }
 0x63f   :  { %v1247_v35 = vpop.f32.mrf.mxu0  ;;  %v1349_v53 = vpop.f32.mrf.mxu1 }
 0x640   :  { %v1360_v54 = vmax.f32 %v1247_v35, %v1349_v53  ;;  %2236 = vmatprep.subr.mxu0 %v1361_v34 }
 0x641   :  { %2237 = vmatpush3.msra.mxu0 %v1361_v34 }
 0x642   :  { %2238 = vmatprep.subr.mxu0 %v1360_v54 }
 0x643   :  { %2239 = vmatpush3.msra.mxu0 %v1360_v54 }
 0x644   :  { %2240 = vmatprep.subr.mxu0 %v1359_v55 }
 0x645   :  { %2241 = vmatpush3.msra.mxu0 %v1359_v55 }
 0x646   :  { %2242 = vmatprep.subr.mxu0 %v1358_v56 }
 0x647   :  { %2243 = vmatpush3.msra.mxu0 %v1358_v56 }
 0x648   :  { %2245 = vmatmul.mubr.msk.f32.vlgmr.msra.gmra.mxu0 %vm1364_vm4, %v1363_v57  ;;  %2247 = vmatprep.subr.mxu0 %v1361_v34 }
 0x649   :  { %2248 = vmatpush3.msra.mxu0 %v1361_v34  ;;  %2255 = vmatprep.mubr.msk.f32.mxu0 %vm1364_vm4, %v1620_v58 }
 0x64a   :  { %2249 = vmatprep.subr.mxu0 %v1360_v54 }
 0x64b   :  { %2250 = vmatpush3.msra.mxu0 %v1360_v54 }
 0x64c   :  { %2251 = vmatprep.subr.mxu0 %v1359_v55 }
 0x64d   :  { %2252 = vmatpush3.msra.mxu0 %v1359_v55 }
 0x64e   :  { %2253 = vmatprep.subr.mxu0 %v1358_v56 }
 0x64f   :  { %2254 = vmatpush3.msra.mxu0 %v1358_v56 }
 0x650   :  { %2256 = vmatmul.mubr.msk.f32.vlgmr.msra.gmra.mxu0 %vm1364_vm4, %v1621_v59 }
 0x708   :  { %v2246_v60 = vpop.f32.mrf.mxu0 }
 0x70a   :  { %v1437_v61 = vpop.f32.mrf.mxu0 }
 0x710   :  { %v2257_v62 = vpop.f32.mrf.mxu0 }
 0x711   :  { %v1531_v37 = vmax.f32 %v2246_v60, %v2257_v62 }
 0x712   :  { %v1521_v38 = vpop.f32.mrf.mxu0 }
 0x713   :  { %1533 = vst.msk [vmem:[%s2987_s8 + $0x8] sm:$0xff] %vm54_vm0, %v1531_v37  ;;  %v1530_v39 = vmax.f32 %v1437_v61, %v1521_v38 }
 0x715   :  { %1532 = vst.msk [vmem:[%s2987_s8] sm:$0xff] %vm54_vm0, %v1530_v39 }

</bundles_post_ra>
